<compile_context>
chip_gen: v7x
topology: tpu7x:2x2x1
jax: 0.10.0
libtpu: 0.0.40
codegen_flags: <defaults>
</compile_context>

<pallas_src>
import jax
import jax.numpy as jnp
from jax.experimental import pallas as pl
from jax.experimental.pallas import tpu as pltpu

_LANE = 128                       # lane width -> gates / hidden padded to multiples
_SUB = 8                          # f32 sublane count -> batch padding unit
_VMEM_BUDGET = 24 * 1024 * 1024   # per-chunk working-set target (fits v7x 64 MiB VMEM)


def _round_up(x, m):
    return (x + m - 1) // m * m


def _pad_gate_cols(w, h, hp):
    """(..., 3*h) with gate order (r, z, n) -> (..., 3*hp), each gate zero-padded."""
    lead = w.shape[:-1]
    w3 = w.reshape(lead + (3, h))
    w3 = jnp.pad(w3, [(0, 0)] * len(lead) + [(0, 0), (0, hp - h)])
    return w3.reshape(lead + (3 * hp,))


def _pad_rows(w, rows, rows_p):
    return jnp.pad(w, ((0, rows_p - rows), (0, 0)))


def _vmem_bytes(bc, T, Hp, Ep, L, L_in, wbytes):
    """Rough VMEM working-set estimate for one batch chunk (IO double-buffered)."""
    fb = 4
    io = 2 * (T * bc * Ep + 2 * L * bc * Hp + bc * _LANE + T * bc * Hp) * fb
    wts = 2 * (Ep * 3 * Hp + L_in * Hp * 3 * Hp + L * Hp * 3 * Hp) * wbytes
    wts += 2 * L * 4 * Hp * fb
    scr = (T * bc * 4 * Hp + bc * Hp) * fb
    return io + wts + scr


def _choose_batch_chunk(bp, T, Hp, Ep, L, L_in, wbytes):
    # The grid over batch chunks is a *serial* loop on one TensorCore, so use
    # the largest chunk that fits the VMEM budget (fewest T x L replays, full
    # MXU row utilization).
    # TODO(synk): on v7x (2 TensorCores) split large batches into exactly 2
    # chunks so dimension_semantics=("parallel",) shards across both cores.
    # TODO(synk): for very long T add an "arbitrary" time-chunk grid axis
    # (hidden carried in scratch) so VMEM is bounded independent of T.
    bc = min(bp, 512)
    while bc > _SUB and _vmem_bytes(bc, T, Hp, Ep, L, L_in, wbytes) > _VMEM_BUDGET:
        bc -= _SUB
    return bc


# ---------------------------------------------------------------------------
# Fused Pallas kernel: all GRU layers, full sequence, grid = batch chunks.
# ---------------------------------------------------------------------------
def _make_encoder_kernel(n_layers, T, Bc, Hp, Ep):
    G = 3 * Hp

    def kernel(tmax_ref, lens_ref, emb_ref, h0_ref, w_ih0_ref, w_ih_rest_ref,
               w_hh_ref, b_gi_ref, b_hn_ref, out_ref, state_ref,
               gi_scr, act_scr, h_scr):
        t_max = tmax_ref[pl.program_id(0)]        # chunk max length (early exit)
        lens = lens_ref[...]                      # (Bc, 1) int32, hoisted

        for layer in range(n_layers):
            is_last = layer == n_layers - 1

            # Input projection for this layer: ONE big matmul over the whole
            # sequence, off the sequential critical path.  Layer 0 projects
            # the raw embeddings; deeper layers project the previous layer's
            # (masked) outputs resident in VMEM.  The r/z halves of b_hh are
            # pre-folded into b_gi.
            if layer == 0:
                x = emb_ref[...].reshape(T * Bc, Ep)
                w_in = w_ih0_ref[...]
            else:
                x = act_scr[...]
                w_in = w_ih_rest_ref[layer - 1]
            gi_scr[...] = (
                jnp.dot(x.astype(w_in.dtype), w_in,
                        preferred_element_type=jnp.float32)
                + b_gi_ref[layer])

            h_scr[...] = h0_ref[layer]
            w_hh_l = w_hh_ref[layer]                               # (Hp, 3Hp)
            b_hn = jnp.broadcast_to(b_hn_ref[layer], (Bc, Hp))     # hoisted bcast

            # TODO(synk): stage w_hh_l in the MXU across the time loop with
            # pltpu.matmul_push_rhs / matmul_acc_lhs / matmul_pop to avoid
            # re-pushing the RHS every step.
            def step(t, carry, _last=is_last):
                row = pl.multiple_of(t * Bc, Bc)
                h = h_scr[...]                                     # (Bc, Hp)
                gh = jnp.dot(h.astype(w_hh_l.dtype), w_hh_l,
                             preferred_element_type=jnp.float32)   # (Bc, 3Hp)
                gi = gi_scr[pl.ds(row, Bc), :]
                # PyTorch GRU gate order (r, z, n); sigmoid via tanh -> one
                # EUP op per slab.  Each gate is a lane-aligned Hp slab.
                rz = 0.5 * jnp.tanh(0.5 * (gi[:, :2 * Hp] + gh[:, :2 * Hp])) + 0.5
                r = rz[:, :Hp]
                z = rz[:, Hp:]
                n = jnp.tanh(gi[:, 2 * Hp:] + r * (gh[:, 2 * Hp:] + b_hn))
                h_new = (1.0 - z) * n + z * h
                # packed-sequence masking: freeze hidden & zero padded rows.
                m = (t < lens).astype(jnp.float32)                 # (Bc, 1)
                out_t = m * h_new
                h_scr[...] = h + m * (h_new - h)
                if _last:
                    out_ref[t] = out_t
                else:
                    act_scr[pl.ds(row, Bc), :] = out_t
                return carry

            # Early exit: steps >= t_max are fully padded for this chunk.
            jax.lax.fori_loop(0, t_max, step, 0)
            state_ref[layer] = h_scr[...]          # final hidden, once per layer

            if is_last:
                def zero_tail(t, carry):
                    out_ref[t] = jnp.zeros((Bc, Hp), jnp.float32)
                    return carry
                jax.lax.fori_loop(t_max, T, zero_tail, 0)

    return kernel


def _encoder_gru(tmax, lens, emb, h0, w_ih0, w_ih_rest, w_hh, b_gi, b_hn):
    """All layers of the GRU in one pallas_call.

    tmax:       (n_chunks,)  int32  per-chunk max length (scalar prefetch)
    lens:       (Bp, 1)      int32  per-row valid lengths
    emb:        (T, Bp, Ep)  f32    embedded inputs (time-major, padded)
    h0:         (L, Bp, Hp)  f32
    w_ih0:      (Ep, 3Hp)           layer-0 input weights
    w_ih_rest:  (max(L-1,1), Hp, 3Hp)
    w_hh:       (L, Hp, 3Hp)
    b_gi:       (L, 1, 3Hp)  f32    b_ih + (r,z parts of b_hh)
    b_hn:       (L, 1, Hp)   f32    n-gate hidden bias
    returns (out (T, Bp, Hp), state (L, Bp, Hp))
    """
    T, Bp, Ep = emb.shape
    L, _, Hp = h0.shape
    G = 3 * Hp
    L_in = w_ih_rest.shape[0]
    n_chunks = tmax.shape[0]
    Bc = Bp // n_chunks

    wbytes = jnp.dtype(w_hh.dtype).itemsize
    est = _vmem_bytes(Bc, T, Hp, Ep, L, L_in, wbytes)
    vmem_limit = int(min(max(est * 3 // 2, 32 * 1024 * 1024), 128 * 1024 * 1024))

    kernel = _make_encoder_kernel(L, T, Bc, Hp, Ep)

    grid_spec = pltpu.PrefetchScalarGridSpec(
        num_scalar_prefetch=1,
        grid=(n_chunks,),
        in_specs=[
            pl.BlockSpec((Bc, 1), lambda i, tm: (i, 0)),           # lengths
            pl.BlockSpec((T, Bc, Ep), lambda i, tm: (0, i, 0)),    # embeddings
            pl.BlockSpec((L, Bc, Hp), lambda i, tm: (0, i, 0)),    # h0
            pl.BlockSpec((Ep, G), lambda i, tm: (0, 0)),           # W_ih^T layer 0
            pl.BlockSpec((L_in, Hp, G), lambda i, tm: (0, 0, 0)),  # W_ih^T layers>=1
            pl.BlockSpec((L, Hp, G), lambda i, tm: (0, 0, 0)),     # W_hh^T
            pl.BlockSpec((L, 1, G), lambda i, tm: (0, 0, 0)),      # b_ih + b_hh(r,z)
            pl.BlockSpec((L, 1, Hp), lambda i, tm: (0, 0, 0)),     # b_hh(n)
        ],
        out_specs=[
            pl.BlockSpec((T, Bc, Hp), lambda i, tm: (0, i, 0)),    # outputs
            pl.BlockSpec((L, Bc, Hp), lambda i, tm: (0, i, 0)),    # final hidden
        ],
        scratch_shapes=[
            pltpu.VMEM((T * Bc, G), jnp.float32),    # current layer input gates
            pltpu.VMEM((T * Bc, Hp), jnp.float32),   # inter-layer activations
            pltpu.VMEM((Bc, Hp), jnp.float32),       # carried hidden state
        ],
    )

    # TODO(synk): single-buffer the grid-invariant weight inputs
    # (pipeline_mode=pl.Buffered(1)) when weights dominate VMEM (large Hp/L).
    return pl.pallas_call(
        kernel,
        out_shape=(jax.ShapeDtypeStruct((T, Bp, Hp), jnp.float32),
                   jax.ShapeDtypeStruct((L, Bp, Hp), jnp.float32)),
        grid_spec=grid_spec,
        compiler_params=pltpu.CompilerParams(
            dimension_semantics=("parallel",),       # batch chunks independent
            vmem_limit_bytes=vmem_limit),
    )(tmax, lens, emb, h0, w_ih0, w_ih_rest, w_hh, b_gi, b_hn)


# ---------------------------------------------------------------------------
# Encoder: Embedding + n_layers GRU (batch_first), packed-sequence semantics.
# ---------------------------------------------------------------------------
def init_encoder_params(key, l_dict_qa, embedding_qa_size, hidden_units, n_layers,
                        param_dtype=jnp.float32):
    # param_dtype=jnp.bfloat16 halves weight VMEM/DMA and MXU passes for large
    # hidden_units; matmuls keep f32 accumulation (preferred_element_type).
    E, H, L = embedding_qa_size, hidden_units, n_layers
    Hp = _round_up(max(H, _LANE), _LANE)
    Ep = _round_up(max(E, _LANE), _LANE)
    keys = jax.random.split(key, 1 + 4 * L)
    k = 1.0 / (float(H) ** 0.5)

    embedding = jax.random.normal(keys[0], (l_dict_qa, E), jnp.float32)

    def qdq(w):   # round-trip through param_dtype so kernel & reference agree
        return w.astype(param_dtype).astype(jnp.float32)

    ref_layers = []
    for l in range(L):
        in_size = E if l == 0 else H
        kw = keys[1 + 4 * l: 1 + 4 * (l + 1)]
        ref_layers.append({
            "w_ih_t": qdq(jax.random.uniform(kw[0], (in_size, 3 * H), jnp.float32, -k, k)),
            "w_hh_t": qdq(jax.random.uniform(kw[1], (H, 3 * H), jnp.float32, -k, k)),
            "b_ih": jax.random.uniform(kw[2], (1, 3 * H), jnp.float32, -k, k),
            "b_hh": jax.random.uniform(kw[3], (1, 3 * H), jnp.float32, -k, k),
        })

    # Lane-aligned, gate-padded layouts consumed by the Pallas kernel.
    w_ih0 = _pad_rows(_pad_gate_cols(ref_layers[0]["w_ih_t"], H, Hp),
                      E, Ep).astype(param_dtype)                          # (Ep, 3Hp)
    w_hh = jnp.stack([_pad_rows(_pad_gate_cols(lp["w_hh_t"], H, Hp), H, Hp)
                      for lp in ref_layers]).astype(param_dtype)          # (L, Hp, 3Hp)
    if L > 1:
        w_ih_rest = jnp.stack(
            [_pad_rows(_pad_gate_cols(lp["w_ih_t"], H, Hp), H, Hp)
             for lp in ref_layers[1:]]).astype(param_dtype)               # (L-1, Hp, 3Hp)
    else:
        w_ih_rest = jnp.zeros((1, Hp, 3 * Hp), param_dtype)

    b_ih_p = jnp.stack([_pad_gate_cols(lp["b_ih"], H, Hp) for lp in ref_layers])
    b_hh_p = jnp.stack([_pad_gate_cols(lp["b_hh"], H, Hp) for lp in ref_layers])
    # Fold r/z halves of b_hh into the precomputed input gates; the n-gate
    # hidden bias must stay inside r*(...) per PyTorch GRU semantics.
    b_gi = b_ih_p + jnp.concatenate(
        [b_hh_p[:, :, :2 * Hp], jnp.zeros((L, 1, Hp), jnp.float32)], axis=-1)
    b_hn = b_hh_p[:, :, 2 * Hp:]                                          # (L, 1, Hp)

    return {
        "embedding": embedding,
        "w_ih0": w_ih0, "w_ih_rest": w_ih_rest, "w_hh": w_hh,
        "b_gi": b_gi, "b_hn": b_hn,
        "ref_layers": ref_layers,   # unpadded copies for the pure-JAX reference
    }


def encoder_forward(params, encoder_input, encoder_input_length, hidden):
    """Matches Encoder.forward.

    encoder_input:        (B, T) int32 token ids
    encoder_input_length: (B,)   int32 valid lengths
    hidden:               (n_layers, B, H) float32
    returns (output (B, T, H), state (n_layers, B, H))
    """
    B, T = encoder_input.shape
    L, _, H = hidden.shape
    Hp = params["w_hh"].shape[1]
    Ep = params["w_ih0"].shape[0]
    L_in = params["w_ih_rest"].shape[0]
    wbytes = jnp.dtype(params["w_hh"].dtype).itemsize

    Bp8 = _round_up(B, _SUB)
    Bc = _choose_batch_chunk(Bp8, T, Hp, Ep, L, L_in, wbytes)
    n_chunks = -(-Bp8 // Bc)
    Bp = n_chunks * Bc

    # Embedding lookup (glue in plain JAX), time-major, padded.
    emb = jnp.take(params["embedding"], encoder_input, axis=0)            # (B, T, E)
    E = emb.shape[-1]
    emb = jnp.transpose(emb, (1, 0, 2))                                   # (T, B, E)
    emb = jnp.pad(emb, ((0, 0), (0, Bp - B), (0, Ep - E)))                # (T, Bp, Ep)

    if B > 1:
        lengths = encoder_input_length.astype(jnp.int32)
    else:
        # batch==1 branch in the PyTorch module does NOT pack: full sequence.
        lengths = jnp.full((B,), T, jnp.int32)
    lens_flat = jnp.pad(lengths, (0, Bp - B))                             # pad rows -> 0
    tmax = jnp.max(lens_flat.reshape(n_chunks, Bc), axis=1).astype(jnp.int32)
    lens = lens_flat.reshape(Bp, 1)

    h0 = jnp.pad(hidden, ((0, 0), (0, Bp - B), (0, Hp - H)))              # (L, Bp, Hp)

    out_pad, state_pad = _encoder_gru(tmax, lens, emb, h0,
                                      params["w_ih0"], params["w_ih_rest"],
                                      params["w_hh"], params["b_gi"],
                                      params["b_hn"])

    # TODO(synk): GRU inter-layer dropout (params.drop_prob) is a no-op at
    # inference; not implemented here.
    output = jnp.transpose(out_pad[:, :B, :H], (1, 0, 2))                 # (B, T, H)
    state = state_pad[:, :B, :H]                                          # (L, B, H)
    return output, state


def initial_hidden(n_layers, batch_size, hidden_units):
    return jnp.zeros((n_layers, batch_size, hidden_units), jnp.float32)


# ---------------------------------------------------------------------------
# Pure-JAX reference (unpadded weights) for validating the Pallas kernel.
# ---------------------------------------------------------------------------
def _gru_layer_ref(x_tbe, h0, w_ih_t, w_hh_t, b_ih, b_hh, lengths):
    H = h0.shape[-1]

    def step(h, inputs):
        x_t, t = inputs
        gi = jnp.dot(x_t, w_ih_t, precision=jax.lax.Precision.HIGHEST) + b_ih
        gh = jnp.dot(h, w_hh_t, precision=jax.lax.Precision.HIGHEST) + b_hh
        r = jax.nn.sigmoid(gi[:, :H] + gh[:, :H])
        z = jax.nn.sigmoid(gi[:, H:2 * H] + gh[:, H:2 * H])
        n = jnp.tanh(gi[:, 2 * H:] + r * gh[:, 2 * H:])
        h_new = (1.0 - z) * n + z * h
        m = (lengths > t).astype(jnp.float32)[:, None]
        h_next = m * h_new + (1.0 - m) * h
        return h_next, m * h_new

    h_final, outs = jax.lax.scan(step, h0, (x_tbe, jnp.arange(x_tbe.shape[0])))
    return outs, h_final


def encoder_forward_ref(params, encoder_input, encoder_input_length, hidden):
    B, T = encoder_input.shape
    emb = jnp.take(params["embedding"], encoder_input, axis=0)
    lengths = (encoder_input_length.astype(jnp.int32)
               if B > 1 else jnp.full((B,), T, jnp.int32))
    x = jnp.transpose(emb, (1, 0, 2))
    states = []
    for l, lp in enumerate(params["ref_layers"]):
        x, s = _gru_layer_ref(x, hidden[l], lp["w_ih_t"], lp["w_hh_t"],
                              lp["b_ih"], lp["b_hh"], lengths)
        states.append(s)
    return jnp.transpose(x, (1, 0, 2)), jnp.stack(states, axis=0)


# ---------------------------------------------------------------------------
if __name__ == "__main__":
    # Small config consistent with the module: params.embedding_qa_size=32,
    # params.hidden_units=32, params.n_layers=2, l_dict_qa=100.
    L_DICT = 100
    EMB = 32
    HID = 32
    N_LAYERS = 2
    B, T = 4, 8

    key = jax.random.PRNGKey(0)
    kp, ki = jax.random.split(key)
    params = init_encoder_params(kp, L_DICT, EMB, HID, N_LAYERS)

    encoder_input = jax.random.randint(ki, (B, T), 0, L_DICT, jnp.int32)
    encoder_input_length = jnp.array([8, 7, 5, 3], jnp.int32)   # sorted desc
    hidden = initial_hidden(N_LAYERS, B, HID)

    fwd = jax.jit(encoder_forward)
    output, state = fwd(params, encoder_input, encoder_input_length, hidden)
    output = jax.block_until_ready(output)
    state = jax.block_until_ready(state)

    # sanity check against a pure-JAX (unpadded-weight) reference
    ref_out, ref_state = encoder_forward_ref(params, encoder_input,
                                             encoder_input_length, hidden)
    assert output.shape == (B, T, HID)
    assert state.shape == (N_LAYERS, B, HID)
    assert jnp.allclose(output, ref_out, rtol=1e-3, atol=1e-3)
    assert jnp.allclose(state, ref_state, rtol=1e-3, atol=1e-3)

    print("KERNEL_OK")
</pallas_src>

<mosaic_0001>
module attributes {stable_mosaic.version = 11 : i64} {
  func.func @kernel(%arg0: i32, %arg1: memref<1xi32, #tpu.memory_space<smem>>, %arg2: memref<8x1xi32, #tpu.memory_space<vmem>>, %arg3: memref<8x8x128xf32, #tpu.memory_space<vmem>>, %arg4: memref<2x8x128xf32, #tpu.memory_space<vmem>>, %arg5: memref<128x384xf32, #tpu.memory_space<vmem>>, %arg6: memref<1x128x384xf32, #tpu.memory_space<vmem>>, %arg7: memref<2x128x384xf32, #tpu.memory_space<vmem>>, %arg8: memref<2x1x384xf32, #tpu.memory_space<vmem>>, %arg9: memref<2x1x128xf32, #tpu.memory_space<vmem>>, %arg10: memref<8x8x128xf32, #tpu.memory_space<vmem>>, %arg11: memref<2x8x128xf32, #tpu.memory_space<vmem>>, %arg12: memref<64x384xf32, #tpu.memory_space<vmem>>, %arg13: memref<64x128xf32, #tpu.memory_space<vmem>>, %arg14: memref<8x128xf32, #tpu.memory_space<vmem>>) attributes {dimension_semantics = [#tpu.dimension_semantics<parallel>], iteration_bounds = array<i64: 1>, scalar_prefetch = 1 : i64, scratch_operands = 3 : i64, tpu.core_type = #tpu.core_type<tc>, window_params = [{transform_indices = @transform_0, window_bounds = array<i64: 8, 1>}, {transform_indices = @transform_1, window_bounds = array<i64: 8, 8, 128>}, {transform_indices = @transform_2, window_bounds = array<i64: 2, 8, 128>}, {pipeline_mode = #tpu.pipeline_mode<synchronous>, transform_indices = @transform_3, window_bounds = array<i64: 128, 384>}, {pipeline_mode = #tpu.pipeline_mode<synchronous>, transform_indices = @transform_4, window_bounds = array<i64: 1, 128, 384>}, {pipeline_mode = #tpu.pipeline_mode<synchronous>, transform_indices = @transform_5, window_bounds = array<i64: 2, 128, 384>}, {pipeline_mode = #tpu.pipeline_mode<synchronous>, transform_indices = @transform_6, window_bounds = array<i64: 2, 1, 384>}, {pipeline_mode = #tpu.pipeline_mode<synchronous>, transform_indices = @transform_7, window_bounds = array<i64: 2, 1, 128>}, {transform_indices = @transform_8, window_bounds = array<i64: 8, 8, 128>}, {transform_indices = @transform_9, window_bounds = array<i64: 2, 8, 128>}]} {
    %0 = arith.index_cast %arg0 : i32 to index
    %1 = memref.load %arg1[%0] : memref<1xi32, #tpu.memory_space<smem>>
    %c0 = arith.constant 0 : index
    %c0_0 = arith.constant 0 : index
    %2 = vector.load %arg2[%c0, %c0_0] : memref<8x1xi32, #tpu.memory_space<vmem>>, vector<8x1xi32>
    %c0_1 = arith.constant 0 : index
    %c0_2 = arith.constant 0 : index
    %c0_3 = arith.constant 0 : index
    %3 = vector.load %arg3[%c0_1, %c0_2, %c0_3] : memref<8x8x128xf32, #tpu.memory_space<vmem>>, vector<8x8x128xf32>
    %4 = vector.shape_cast %3 : vector<8x8x128xf32> to vector<64x128xf32>
    %c0_4 = arith.constant 0 : index
    %c0_5 = arith.constant 0 : index
    %5 = vector.load %arg5[%c0_4, %c0_5] : memref<128x384xf32, #tpu.memory_space<vmem>>, vector<128x384xf32>
    %cst = arith.constant dense<0.000000e+00> : vector<64x384xf32>
    %6 = tpu.matmul %4, %5, %cst {dimension_numbers = #tpu.dot_dimension_numbers<[1], [0], [0], [1], [0, 0, 1, 1], [], []>} : vector<64x128xf32>, vector<128x384xf32>, vector<64x384xf32> -> vector<64x384xf32>
    %c0_6 = arith.constant 0 : index
    %c0_7 = arith.constant 0 : index
    %c0_8 = arith.constant 0 : index
    %7 = vector.load %arg8[%c0_6, %c0_7, %c0_8] : memref<2x1x384xf32, #tpu.memory_space<vmem>>, vector<1x1x384xf32>
    %8 = vector.shape_cast %7 : vector<1x1x384xf32> to vector<1x384xf32>
    %9 = vector.broadcast %8 : vector<1x384xf32> to vector<64x384xf32>
    %10 = arith.addf %6, %9 : vector<64x384xf32>
    %c0_9 = arith.constant 0 : index
    %c0_10 = arith.constant 0 : index
    %11 = vector.load %arg12[%c0_9, %c0_10] : memref<64x384xf32, #tpu.memory_space<vmem>>, vector<64x384xf32>
    tpu.vector_store %arg12[%c0_9, %c0_10], %10 {strides = array<i32>} : memref<64x384xf32, #tpu.memory_space<vmem>>, vector<64x384xf32>,
    %c0_11 = arith.constant 0 : index
    %c0_12 = arith.constant 0 : index
    %c0_13 = arith.constant 0 : index
    %12 = vector.load %arg4[%c0_11, %c0_12, %c0_13] : memref<2x8x128xf32, #tpu.memory_space<vmem>>, vector<1x8x128xf32>
    %13 = vector.shape_cast %12 : vector<1x8x128xf32> to vector<8x128xf32>
    %c0_14 = arith.constant 0 : index
    %c0_15 = arith.constant 0 : index
    %14 = vector.load %arg14[%c0_14, %c0_15] : memref<8x128xf32, #tpu.memory_space<vmem>>, vector<8x128xf32>
    tpu.vector_store %arg14[%c0_14, %c0_15], %13 {strides = array<i32>} : memref<8x128xf32, #tpu.memory_space<vmem>>, vector<8x128xf32>,
    %c0_16 = arith.constant 0 : index
    %c0_17 = arith.constant 0 : index
    %c0_18 = arith.constant 0 : index
    %15 = vector.load %arg7[%c0_16, %c0_17, %c0_18] : memref<2x128x384xf32, #tpu.memory_space<vmem>>, vector<1x128x384xf32>
    %16 = vector.shape_cast %15 : vector<1x128x384xf32> to vector<128x384xf32>
    %c0_19 = arith.constant 0 : index
    %c0_20 = arith.constant 0 : index
    %c0_21 = arith.constant 0 : index
    %17 = vector.load %arg9[%c0_19, %c0_20, %c0_21] : memref<2x1x128xf32, #tpu.memory_space<vmem>>, vector<1x1x128xf32>
    %18 = vector.shape_cast %17 : vector<1x1x128xf32> to vector<1x128xf32>
    %19 = vector.shape_cast %18 : vector<1x128xf32> to vector<1x128xf32>
    %20 = vector.broadcast %19 : vector<1x128xf32> to vector<8x128xf32>
    %c0_i32 = arith.constant 0 : i32
    %c0_i32_22 = arith.constant 0 : i32
    %21 = arith.subi %1, %c0_i32_22 : i32
    %22 = arith.addi %c0_i32_22, %21 : i32
    %c1_i32 = arith.constant 1 : i32
    scf.for %arg15 = %c0_i32_22 to %22 step %c1_i32  : i32 {
      %c8_i32_59 = arith.constant 8 : i32
      %53 = arith.muli %arg15, %c8_i32_59 : i32
      %54 = tpu.assume_multiple %53, 8 : i32
      %c0_60 = arith.constant 0 : index
      %c0_61 = arith.constant 0 : index
      %55 = vector.load %arg14[%c0_60, %c0_61] : memref<8x128xf32, #tpu.memory_space<vmem>>, vector<8x128xf32>
      %cst_62 = arith.constant dense<0.000000e+00> : vector<8x384xf32>
      %56 = tpu.matmul %55, %16, %cst_62 {dimension_numbers = #tpu.dot_dimension_numbers<[1], [0], [0], [1], [0, 0, 1, 1], [], []>} : vector<8x128xf32>, vector<128x384xf32>, vector<8x384xf32> -> vector<8x384xf32>
      %57 = arith.index_cast %54 : i32 to index
      %c0_63 = arith.constant 0 : index
      %58 = vector.load %arg12[%57, %c0_63] : memref<64x384xf32, #tpu.memory_space<vmem>>, vector<8x384xf32>
      %59 = vector.extract_strided_slice %58 {offsets = [0, 0], sizes = [8, 256], strides = [1, 1]} : vector<8x384xf32> to vector<8x256xf32>
      %60 = vector.extract_strided_slice %56 {offsets = [0, 0], sizes = [8, 256], strides = [1, 1]} : vector<8x384xf32> to vector<8x256xf32>
      %61 = arith.addf %59, %60 : vector<8x256xf32>
      %cst_64 = arith.constant 5.000000e-01 : f32
      %62 = vector.broadcast %cst_64 : f32 to vector<8x256xf32>
      %63 = arith.mulf %62, %61 : vector<8x256xf32>
      %64 = math.tanh %63 : vector<8x256xf32>
      %cst_65 = arith.constant 5.000000e-01 : f32
      %65 = vector.broadcast %cst_65 : f32 to vector<8x256xf32>
      %66 = arith.mulf %65, %64 : vector<8x256xf32>
      %cst_66 = arith.constant 5.000000e-01 : f32
      %67 = vector.broadcast %cst_66 : f32 to vector<8x256xf32>
      %68 = arith.addf %66, %67 : vector<8x256xf32>
      %69 = vector.extract_strided_slice %68 {offsets = [0, 0], sizes = [8, 128], strides = [1, 1]} : vector<8x256xf32> to vector<8x128xf32>
      %70 = vector.extract_strided_slice %68 {offsets = [0, 128], sizes = [8, 128], strides = [1, 1]} : vector<8x256xf32> to vector<8x128xf32>
      %71 = vector.extract_strided_slice %58 {offsets = [0, 256], sizes = [8, 128], strides = [1, 1]} : vector<8x384xf32> to vector<8x128xf32>
      %72 = vector.extract_strided_slice %56 {offsets = [0, 256], sizes = [8, 128], strides = [1, 1]} : vector<8x384xf32> to vector<8x128xf32>
      %73 = arith.addf %72, %20 : vector<8x128xf32>
      %74 = arith.mulf %69, %73 : vector<8x128xf32>
      %75 = arith.addf %71, %74 : vector<8x128xf32>
      %76 = math.tanh %75 : vector<8x128xf32>
      %cst_67 = arith.constant 1.000000e+00 : f32
      %77 = vector.broadcast %cst_67 : f32 to vector<8x128xf32>
      %78 = arith.subf %77, %70 : vector<8x128xf32>
      %79 = arith.mulf %78, %76 : vector<8x128xf32>
      %80 = arith.mulf %70, %55 : vector<8x128xf32>
      %81 = arith.addf %79, %80 : vector<8x128xf32>
      %82 = vector.broadcast %arg15 : i32 to vector<8x1xi32>
      %83 = arith.cmpi slt, %82, %2 : vector<8x1xi32>
      %84 = arith.extui %83 : vector<8x1xi1> to vector<8x1xi32>
      %85 = arith.sitofp %84 : vector<8x1xi32> to vector<8x1xf32>
      %86 = vector.broadcast %85 : vector<8x1xf32> to vector<8x128xf32>
      %87 = arith.mulf %86, %81 : vector<8x128xf32>
      %88 = arith.subf %81, %55 : vector<8x128xf32>
      %89 = vector.broadcast %85 : vector<8x1xf32> to vector<8x128xf32>
      %90 = arith.mulf %89, %88 : vector<8x128xf32>
      %91 = arith.addf %55, %90 : vector<8x128xf32>
      %c0_68 = arith.constant 0 : index
      %c0_69 = arith.constant 0 : index
      %92 = vector.load %arg14[%c0_68, %c0_69] : memref<8x128xf32, #tpu.memory_space<vmem>>, vector<8x128xf32>
      tpu.vector_store %arg14[%c0_68, %c0_69], %91 {strides = array<i32>} : memref<8x128xf32, #tpu.memory_space<vmem>>, vector<8x128xf32>,
      %93 = arith.index_cast %54 : i32 to index
      %c0_70 = arith.constant 0 : index
      %94 = vector.load %arg13[%93, %c0_70] : memref<64x128xf32, #tpu.memory_space<vmem>>, vector<8x128xf32>
      tpu.vector_store %arg13[%93, %c0_70], %87 {strides = array<i32>} : memref<64x128xf32, #tpu.memory_space<vmem>>, vector<8x128xf32>,
    }
    %c0_23 = arith.constant 0 : index
    %c0_24 = arith.constant 0 : index
    %23 = vector.load %arg14[%c0_23, %c0_24] : memref<8x128xf32, #tpu.memory_space<vmem>>, vector<8x128xf32>
    %c0_25 = arith.constant 0 : index
    %c0_26 = arith.constant 0 : index
    %c0_27 = arith.constant 0 : index
    %24 = vector.load %arg11[%c0_25, %c0_26, %c0_27] : memref<2x8x128xf32, #tpu.memory_space<vmem>>, vector<1x8x128xf32>
    %25 = vector.shape_cast %24 : vector<1x8x128xf32> to vector<8x128xf32>
    %26 = vector.shape_cast %23 : vector<8x128xf32> to vector<1x8x128xf32>
    tpu.vector_store %arg11[%c0_25, %c0_26, %c0_27], %26 {strides = array<i32>} : memref<2x8x128xf32, #tpu.memory_space<vmem>>, vector<1x8x128xf32>,
    %c0_28 = arith.constant 0 : index
    %c0_29 = arith.constant 0 : index
    %27 = vector.load %arg13[%c0_28, %c0_29] : memref<64x128xf32, #tpu.memory_space<vmem>>, vector<64x128xf32>
    %c0_30 = arith.constant 0 : index
    %c0_31 = arith.constant 0 : index
    %c0_32 = arith.constant 0 : index
    %28 = vector.load %arg6[%c0_30, %c0_31, %c0_32] : memref<1x128x384xf32, #tpu.memory_space<vmem>>, vector<1x128x384xf32>
    %29 = vector.shape_cast %28 : vector<1x128x384xf32> to vector<128x384xf32>
    %cst_33 = arith.constant dense<0.000000e+00> : vector<64x384xf32>
    %30 = tpu.matmul %27, %29, %cst_33 {dimension_numbers = #tpu.dot_dimension_numbers<[1], [0], [0], [1], [0, 0, 1, 1], [], []>} : vector<64x128xf32>, vector<128x384xf32>, vector<64x384xf32> -> vector<64x384xf32>
    %c1 = arith.constant 1 : index
    %c0_34 = arith.constant 0 : index
    %c0_35 = arith.constant 0 : index
    %31 = vector.load %arg8[%c1, %c0_34, %c0_35] : memref<2x1x384xf32, #tpu.memory_space<vmem>>, vector<1x1x384xf32>
    %32 = vector.shape_cast %31 : vector<1x1x384xf32> to vector<1x384xf32>
    %33 = vector.broadcast %32 : vector<1x384xf32> to vector<64x384xf32>
    %34 = arith.addf %30, %33 : vector<64x384xf32>
    %c0_36 = arith.constant 0 : index
    %c0_37 = arith.constant 0 : index
    %35 = vector.load %arg12[%c0_36, %c0_37] : memref<64x384xf32, #tpu.memory_space<vmem>>, vector<64x384xf32>
    tpu.vector_store %arg12[%c0_36, %c0_37], %34 {strides = array<i32>} : memref<64x384xf32, #tpu.memory_space<vmem>>, vector<64x384xf32>,
    %c1_38 = arith.constant 1 : index
    %c0_39 = arith.constant 0 : index
    %c0_40 = arith.constant 0 : index
    %36 = vector.load %arg4[%c1_38, %c0_39, %c0_40] : memref<2x8x128xf32, #tpu.memory_space<vmem>>, vector<1x8x128xf32>
    %37 = vector.shape_cast %36 : vector<1x8x128xf32> to vector<8x128xf32>
    %c0_41 = arith.constant 0 : index
    %c0_42 = arith.constant 0 : index
    %38 = vector.load %arg14[%c0_41, %c0_42] : memref<8x128xf32, #tpu.memory_space<vmem>>, vector<8x128xf32>
    tpu.vector_store %arg14[%c0_41, %c0_42], %37 {strides = array<i32>} : memref<8x128xf32, #tpu.memory_space<vmem>>, vector<8x128xf32>,
    %c1_43 = arith.constant 1 : index
    %c0_44 = arith.constant 0 : index
    %c0_45 = arith.constant 0 : index
    %39 = vector.load %arg7[%c1_43, %c0_44, %c0_45] : memref<2x128x384xf32, #tpu.memory_space<vmem>>, vector<1x128x384xf32>
    %40 = vector.shape_cast %39 : vector<1x128x384xf32> to vector<128x384xf32>
    %c1_46 = arith.constant 1 : index
    %c0_47 = arith.constant 0 : index
    %c0_48 = arith.constant 0 : index
    %41 = vector.load %arg9[%c1_46, %c0_47, %c0_48] : memref<2x1x128xf32, #tpu.memory_space<vmem>>, vector<1x1x128xf32>
    %42 = vector.shape_cast %41 : vector<1x1x128xf32> to vector<1x128xf32>
    %43 = vector.shape_cast %42 : vector<1x128xf32> to vector<1x128xf32>
    %44 = vector.broadcast %43 : vector<1x128xf32> to vector<8x128xf32>
    %c0_i32_49 = arith.constant 0 : i32
    %c0_i32_50 = arith.constant 0 : i32
    %45 = arith.subi %1, %c0_i32_50 : i32
    %46 = arith.addi %c0_i32_50, %45 : i32
    %c1_i32_51 = arith.constant 1 : i32
    scf.for %arg15 = %c0_i32_50 to %46 step %c1_i32_51  : i32 {
      %c8_i32_59 = arith.constant 8 : i32
      %53 = arith.muli %arg15, %c8_i32_59 : i32
      %54 = tpu.assume_multiple %53, 8 : i32
      %c0_60 = arith.constant 0 : index
      %c0_61 = arith.constant 0 : index
      %55 = vector.load %arg14[%c0_60, %c0_61] : memref<8x128xf32, #tpu.memory_space<vmem>>, vector<8x128xf32>
      %cst_62 = arith.constant dense<0.000000e+00> : vector<8x384xf32>
      %56 = tpu.matmul %55, %40, %cst_62 {dimension_numbers = #tpu.dot_dimension_numbers<[1], [0], [0], [1], [0, 0, 1, 1], [], []>} : vector<8x128xf32>, vector<128x384xf32>, vector<8x384xf32> -> vector<8x384xf32>
      %57 = arith.index_cast %54 : i32 to index
      %c0_63 = arith.constant 0 : index
      %58 = vector.load %arg12[%57, %c0_63] : memref<64x384xf32, #tpu.memory_space<vmem>>, vector<8x384xf32>
      %59 = vector.extract_strided_slice %58 {offsets = [0, 0], sizes = [8, 256], strides = [1, 1]} : vector<8x384xf32> to vector<8x256xf32>
      %60 = vector.extract_strided_slice %56 {offsets = [0, 0], sizes = [8, 256], strides = [1, 1]} : vector<8x384xf32> to vector<8x256xf32>
      %61 = arith.addf %59, %60 : vector<8x256xf32>
      %cst_64 = arith.constant 5.000000e-01 : f32
      %62 = vector.broadcast %cst_64 : f32 to vector<8x256xf32>
      %63 = arith.mulf %62, %61 : vector<8x256xf32>
      %64 = math.tanh %63 : vector<8x256xf32>
      %cst_65 = arith.constant 5.000000e-01 : f32
      %65 = vector.broadcast %cst_65 : f32 to vector<8x256xf32>
      %66 = arith.mulf %65, %64 : vector<8x256xf32>
      %cst_66 = arith.constant 5.000000e-01 : f32
      %67 = vector.broadcast %cst_66 : f32 to vector<8x256xf32>
      %68 = arith.addf %66, %67 : vector<8x256xf32>
      %69 = vector.extract_strided_slice %68 {offsets = [0, 0], sizes = [8, 128], strides = [1, 1]} : vector<8x256xf32> to vector<8x128xf32>
      %70 = vector.extract_strided_slice %68 {offsets = [0, 128], sizes = [8, 128], strides = [1, 1]} : vector<8x256xf32> to vector<8x128xf32>
      %71 = vector.extract_strided_slice %58 {offsets = [0, 256], sizes = [8, 128], strides = [1, 1]} : vector<8x384xf32> to vector<8x128xf32>
      %72 = vector.extract_strided_slice %56 {offsets = [0, 256], sizes = [8, 128], strides = [1, 1]} : vector<8x384xf32> to vector<8x128xf32>
      %73 = arith.addf %72, %44 : vector<8x128xf32>
      %74 = arith.mulf %69, %73 : vector<8x128xf32>
      %75 = arith.addf %71, %74 : vector<8x128xf32>
      %76 = math.tanh %75 : vector<8x128xf32>
      %cst_67 = arith.constant 1.000000e+00 : f32
      %77 = vector.broadcast %cst_67 : f32 to vector<8x128xf32>
      %78 = arith.subf %77, %70 : vector<8x128xf32>
      %79 = arith.mulf %78, %76 : vector<8x128xf32>
      %80 = arith.mulf %70, %55 : vector<8x128xf32>
      %81 = arith.addf %79, %80 : vector<8x128xf32>
      %82 = vector.broadcast %arg15 : i32 to vector<8x1xi32>
      %83 = arith.cmpi slt, %82, %2 : vector<8x1xi32>
      %84 = arith.extui %83 : vector<8x1xi1> to vector<8x1xi32>
      %85 = arith.sitofp %84 : vector<8x1xi32> to vector<8x1xf32>
      %86 = vector.broadcast %85 : vector<8x1xf32> to vector<8x128xf32>
      %87 = arith.mulf %86, %81 : vector<8x128xf32>
      %88 = arith.subf %81, %55 : vector<8x128xf32>
      %89 = vector.broadcast %85 : vector<8x1xf32> to vector<8x128xf32>
      %90 = arith.mulf %89, %88 : vector<8x128xf32>
      %91 = arith.addf %55, %90 : vector<8x128xf32>
      %c0_68 = arith.constant 0 : index
      %c0_69 = arith.constant 0 : index
      %92 = vector.load %arg14[%c0_68, %c0_69] : memref<8x128xf32, #tpu.memory_space<vmem>>, vector<8x128xf32>
      tpu.vector_store %arg14[%c0_68, %c0_69], %91 {strides = array<i32>} : memref<8x128xf32, #tpu.memory_space<vmem>>, vector<8x128xf32>,
      %93 = arith.index_cast %arg15 : i32 to index
      %c0_70 = arith.constant 0 : index
      %c0_71 = arith.constant 0 : index
      %94 = vector.load %arg10[%93, %c0_70, %c0_71] : memref<8x8x128xf32, #tpu.memory_space<vmem>>, vector<1x8x128xf32>
      %95 = vector.shape_cast %94 : vector<1x8x128xf32> to vector<8x128xf32>
      %96 = vector.shape_cast %87 : vector<8x128xf32> to vector<1x8x128xf32>
      tpu.vector_store %arg10[%93, %c0_70, %c0_71], %96 {strides = array<i32>} : memref<8x8x128xf32, #tpu.memory_space<vmem>>, vector<1x8x128xf32>,
    }
    %c0_52 = arith.constant 0 : index
    %c0_53 = arith.constant 0 : index
    %47 = vector.load %arg14[%c0_52, %c0_53] : memref<8x128xf32, #tpu.memory_space<vmem>>, vector<8x128xf32>
    %c1_54 = arith.constant 1 : index
    %c0_55 = arith.constant 0 : index
    %c0_56 = arith.constant 0 : index
    %48 = vector.load %arg11[%c1_54, %c0_55, %c0_56] : memref<2x8x128xf32, #tpu.memory_space<vmem>>, vector<1x8x128xf32>
    %49 = vector.shape_cast %48 : vector<1x8x128xf32> to vector<8x128xf32>
    %50 = vector.shape_cast %47 : vector<8x128xf32> to vector<1x8x128xf32>
    tpu.vector_store %arg11[%c1_54, %c0_55, %c0_56], %50 {strides = array<i32>} : memref<2x8x128xf32, #tpu.memory_space<vmem>>, vector<1x8x128xf32>,
    %c0_i32_57 = arith.constant 0 : i32
    %c8_i32 = arith.constant 8 : i32
    %51 = arith.subi %c8_i32, %1 : i32
    %52 = arith.addi %1, %51 : i32
    %c1_i32_58 = arith.constant 1 : i32
    scf.for %arg15 = %1 to %52 step %c1_i32_58  : i32 {
      %cst_59 = arith.constant 0.000000e+00 : f32
      %53 = vector.broadcast %cst_59 : f32 to vector<8x128xf32>
      %54 = arith.index_cast %arg15 : i32 to index
      %c0_60 = arith.constant 0 : index
      %c0_61 = arith.constant 0 : index
      %55 = vector.load %arg10[%54, %c0_60, %c0_61] : memref<8x8x128xf32, #tpu.memory_space<vmem>>, vector<1x8x128xf32>
      %56 = vector.shape_cast %55 : vector<1x8x128xf32> to vector<8x128xf32>
      %57 = vector.shape_cast %53 : vector<8x128xf32> to vector<1x8x128xf32>
      tpu.vector_store %arg10[%54, %c0_60, %c0_61], %57 {strides = array<i32>} : memref<8x8x128xf32, #tpu.memory_space<vmem>>, vector<1x8x128xf32>,
    }
    return
  }
  func.func @transform_0(%arg0: i32, %arg1: memref<1xi32, #tpu.memory_space<smem>>) -> (i32, i32) {
    %c0_i32 = arith.constant 0 : i32
    %c0_i32_0 = arith.constant 0 : i32
    return %arg0, %c0_i32 : i32, i32
  }
  func.func @transform_1(%arg0: i32, %arg1: memref<1xi32, #tpu.memory_space<smem>>) -> (i32, i32, i32) {
    %c0_i32 = arith.constant 0 : i32
    %c0_i32_0 = arith.constant 0 : i32
    %c0_i32_1 = arith.constant 0 : i32
    return %c0_i32, %arg0, %c0_i32_0 : i32, i32, i32
  }
  func.func @transform_2(%arg0: i32, %arg1: memref<1xi32, #tpu.memory_space<smem>>) -> (i32, i32, i32) {
    %c0_i32 = arith.constant 0 : i32
    %c0_i32_0 = arith.constant 0 : i32
    %c0_i32_1 = arith.constant 0 : i32
    return %c0_i32, %arg0, %c0_i32_0 : i32, i32, i32
  }
  func.func @transform_3(%arg0: i32, %arg1: memref<1xi32, #tpu.memory_space<smem>>) -> (i32, i32) {
    %c0_i32 = arith.constant 0 : i32
    %c0_i32_0 = arith.constant 0 : i32
    %c0_i32_1 = arith.constant 0 : i32
    return %c0_i32, %c0_i32_0 : i32, i32
  }
  func.func @transform_4(%arg0: i32, %arg1: memref<1xi32, #tpu.memory_space<smem>>) -> (i32, i32, i32) {
    %c0_i32 = arith.constant 0 : i32
    %c0_i32_0 = arith.constant 0 : i32
    %c0_i32_1 = arith.constant 0 : i32
    %c0_i32_2 = arith.constant 0 : i32
    return %c0_i32, %c0_i32_0, %c0_i32_1 : i32, i32, i32
  }
  func.func @transform_5(%arg0: i32, %arg1: memref<1xi32, #tpu.memory_space<smem>>) -> (i32, i32, i32) {
    %c0_i32 = arith.constant 0 : i32
    %c0_i32_0 = arith.constant 0 : i32
    %c0_i32_1 = arith.constant 0 : i32
    %c0_i32_2 = arith.constant 0 : i32
    return %c0_i32, %c0_i32_0, %c0_i32_1 : i32, i32, i32
  }
  func.func @transform_6(%arg0: i32, %arg1: memref<1xi32, #tpu.memory_space<smem>>) -> (i32, i32, i32) {
    %c0_i32 = arith.constant 0 : i32
    %c0_i32_0 = arith.constant 0 : i32
    %c0_i32_1 = arith.constant 0 : i32
    %c0_i32_2 = arith.constant 0 : i32
    return %c0_i32, %c0_i32_0, %c0_i32_1 : i32, i32, i32
  }
  func.func @transform_7(%arg0: i32, %arg1: memref<1xi32, #tpu.memory_space<smem>>) -> (i32, i32, i32) {
    %c0_i32 = arith.constant 0 : i32
    %c0_i32_0 = arith.constant 0 : i32
    %c0_i32_1 = arith.constant 0 : i32
    %c0_i32_2 = arith.constant 0 : i32
    return %c0_i32, %c0_i32_0, %c0_i32_1 : i32, i32, i32
  }
  func.func @transform_8(%arg0: i32, %arg1: memref<1xi32, #tpu.memory_space<smem>>) -> (i32, i32, i32) {
    %c0_i32 = arith.constant 0 : i32
    %c0_i32_0 = arith.constant 0 : i32
    %c0_i32_1 = arith.constant 0 : i32
    return %c0_i32, %arg0, %c0_i32_0 : i32, i32, i32
  }
  func.func @transform_9(%arg0: i32, %arg1: memref<1xi32, #tpu.memory_space<smem>>) -> (i32, i32, i32) {
    %c0_i32 = arith.constant 0 : i32
    %c0_i32_0 = arith.constant 0 : i32
    %c0_i32_1 = arith.constant 0 : i32
    return %c0_i32, %arg0, %c0_i32_0 : i32, i32, i32
  }
}

</mosaic_0001>

<bundles_post_ra>
// kernel: encoder_forward.1
= control target key start
LH: loop header
LB: loop body
LE: loop exit
PB: predicated region body
PF: predicated region fallthrough
CT: control target
= control target key end

     0   :  { %17 = vsyncpa [#allocation8], 0  ;;  %s2579_s0 = inlined_call_operand.<no memory space> [shape: s32[1], index: 0, kind: input, shape index: {}]   ;;  %s2580_s1 = inlined_call_operand.vmem [shape: s32[8,1], index: 1, kind: input, shape index: {}]   ;;  %s2581_s2 = inlined_call_operand.vmem [shape: f32[8,8,128], index: 2, kind: input, shape index: {}]   ;;  %s2582_s3 = inlined_call_operand.vmem [shape: f32[2,8,128], index: 3, kind: input, shape index: {}]   ;;  %s2583_s4 = inlined_call_operand.vmem [shape: f32[128,384], index: 4, kind: input, shape index: {}]   ;;  %s2584_s5 = inlined_call_operand.hbm [shape: f32[1,128,384], index: 5, kind: input, shape index: {}]   ;;  %s2585_s6 = inlined_call_operand.hbm [shape: f32[2,128,384], index: 6, kind: input, shape index: {}]   ;;  %s2586_s7 = inlined_call_operand.vmem [shape: f32[2,1,384], index: 7, kind: input, shape index: {}]   ;;  %s2587_s8 = inlined_call_operand.vmem [shape: f32[2,1,128], index: 8, kind: input, shape index: {}]   ;;  %s2588_s9 = inlined_call_operand.vmem [shape: f32[8,8,128], index: 9, kind: output, shape index: {0}]   ;;  %s2589_s10 = inlined_call_operand.vmem [shape: f32[2,8,128], index: 10, kind: output, shape index: {1}]  }
   0x1   :  { %18 = vsyncpa [#allocation10], 0  ;;  %s1863_s13 = smov [#allocation7]   ;;  %s1791_s17 = scalar_lea.hbm %s2584_s5, 6144 }
   0x2   :  { %s32_s14 = sshll.u32 %s1863_s13, 4  ;;  %p1792_p0 = scmp.ne.s32.totalorder %s2584_s5, %s1791_s17  ;;  %s33_s14 = int_to_ptr.vmem [resolvable:$true] %s32_s14 }
   0x3   :  { %p1795_p1 = scmp.lt.u32.totalorder %s1791_s17, %s2584_s5 }
   0x5   :  { %p1797_p2 = pnand %p1795_p1, %p1792_p0 }
   0x7   :  { %1800 = shalt.err (!%p1797_p2)
}
   0x8   :  { %s1801_s22 = scalar_lea.vmem %s33_s14, 6144  ;;  %p1806_p4 = scmp.lt.s32.totalorder %s33_s14, %s33_s14 }
   0x9   :  { %p1802_p3 = scmp.ne.s32.totalorder %s33_s14, %s1801_s22  ;;  %p1807_p5 = scmp.lt.s32.totalorder %s1801_s22, %s1801_s22 }
   0xb   :  { %p1808_p6 = por %p1807_p5, %p1806_p4 }
   0xd   :  { %p1809_p7 = pnand %p1808_p6, %p1802_p3 }
   0xf   :  { %1812 = shalt.err (!%p1809_p7)
}
  0x10   :  { %s1864_s23 = smov 384   ;;  %s1865_s24 = smov 24  }
  0x11   :  { %38 = dma.hbm_to_vmem [thread:$0]  %s2584_s5, 6144, %s33_s14, [#allocation8], %s1864_s23, %s1864_s23, %s1865_s24  }
  0x12   :  { %s1866_s27 = smov [#allocation9]   ;;  %s1813_s11 = scalar_lea.hbm %s2585_s6, 12288 }
  0x13   :  { %s44_s28 = sshll.u32 %s1866_s27, 4  ;;  %p1814_p8 = scmp.ne.s32.totalorder %s2585_s6, %s1813_s11  ;;  %s45_s28 = int_to_ptr.vmem [resolvable:$true] %s44_s28 }
  0x14   :  { %p1817_p9 = scmp.lt.u32.totalorder %s1813_s11, %s2585_s6 }
  0x16   :  { %p1819_p10 = pnand %p1817_p9, %p1814_p8 }
  0x18   :  { %1822 = shalt.err (!%p1819_p10)
}
  0x19   :  { %s1823_s17 = scalar_lea.vmem %s45_s28, 12288  ;;  %p1828_p12 = scmp.lt.s32.totalorder %s45_s28, %s45_s28 }
  0x1a   :  { %p1824_p11 = scmp.ne.s32.totalorder %s45_s28, %s1823_s17  ;;  %p1829_p13 = scmp.lt.s32.totalorder %s1823_s17, %s1823_s17 }
  0x1c   :  { %p1830_p0 = por %p1829_p13, %p1828_p12 }
  0x1e   :  { %p1831_p1 = pnand %p1830_p0, %p1824_p11 }
  0x20   :  { %1834 = shalt.err (!%p1831_p1)
}
  0x21   :  { %50 = dma.hbm_to_vmem [thread:$0]  %s2585_s6, 12288, %s45_s28, [#allocation10], %s1864_s23, %s1864_s23, %s1865_s24  }
  0x22   :  { %1847 = dma.done.wait [#allocation8], 6144  }
  0x23   :  { %1848 = vsyncadd [#allocation8], 4294961152 }
  0x24   :  { %1849 = dma.done.wait [#allocation10], 12288  }
  0x25   :  { %1850 = vsyncadd [#allocation10], 4294955008  ;;  %v2590_v0 = vmov 0.0   ;;  %v1960_v1 = vld [vmem:[%s2580_s1] sm:$0xff]  ;;  %v1965_v3 = vld [vmem:[#allocation9] sm:$0xff]  ;;  %p1243_p2 = scmp.le.s32.totalorder %s2579_s0, 0 }
  0x26   :  { %200 = vmatprep.mubr.f32.mxu0 %v2590_v0  ;;  %2599 = vst [vmem:[#allocation13_spill] sm:$0xff] %v1960_v1  ;;  %v378_v2 = vld [vmem:[%s2582_s3] sm:$0xff]  ;;  %2600 = vst [vmem:[#allocation14_spill] sm:$0xff] %v1965_v3  ;;  %v1967_v4 = vld [vmem:[#allocation9 + $0x8] sm:$0xff]  ;;  %s2282_s23 = smov (!%p1243_p2), 0  }
  0x27   :  { %379 = vst [vmem:[#allocation4] sm:$0xff] %v378_v2  ;;  %2601 = vst [vmem:[#allocation15_spill] sm:$0xff] %v1967_v4  ;;  %v1969_v5 = vld [vmem:[#allocation9 + $0x10] sm:$0xff]  ;;  %v1971_v6 = vld [vmem:[#allocation9 + $0x18] sm:$0xff] }
  0x28   :  { %2602 = vst [vmem:[#allocation16_spill] sm:$0xff] %v1969_v5  ;;  %v1973_v7 = vld [vmem:[#allocation9 + $0x20] sm:$0xff]  ;;  %v1975_v8 = vld [vmem:[#allocation9 + $0x28] sm:$0xff]  ;;  %v1977_v9 = vld [vmem:[#allocation9 + $0x30] sm:$0xff] }
  0x29   :  { %v1979_v10 = vld [vmem:[#allocation9 + $0x38] sm:$0xff]  ;;  %v1981_v11 = vld [vmem:[#allocation9 + $0x40] sm:$0xff]  ;;  %v1983_v12 = vld [vmem:[#allocation9 + $0x48] sm:$0xff] }
  0x2a   :  { %v1985_v13 = vld [vmem:[#allocation9 + $0x50] sm:$0xff]  ;;  %v1987_v14 = vld [vmem:[#allocation9 + $0x58] sm:$0xff]  ;;  %v1989_v15 = vld [vmem:[#allocation9 + $0x60] sm:$0xff] }
  0x2b   :  { %v1991_v16 = vld [vmem:[#allocation9 + $0x68] sm:$0xff]  ;;  %v1993_v17 = vld [vmem:[#allocation9 + $0x70] sm:$0xff]  ;;  %v1995_v18 = vld [vmem:[#allocation9 + $0x78] sm:$0xff] }
  0x2c   :  { %v1997_v19 = vld [vmem:[#allocation9 + $0x80] sm:$0xff]  ;;  %v1999_v20 = vld [vmem:[#allocation9 + $0x88] sm:$0xff]  ;;  %v2001_v21 = vld [vmem:[#allocation9 + $0x90] sm:$0xff] }
  0x2d   :  { %v2003_v22 = vld [vmem:[#allocation9 + $0x98] sm:$0xff]  ;;  %v2005_v23 = vld [vmem:[#allocation9 + $0xa0] sm:$0xff]  ;;  %v2007_v24 = vld [vmem:[#allocation9 + $0xa8] sm:$0xff] }
  0x2e   :  { %v2009_v25 = vld [vmem:[#allocation9 + $0xb0] sm:$0xff]  ;;  %v2011_v26 = vld [vmem:[#allocation9 + $0xb8] sm:$0xff]  ;;  %v2013_v27 = vld [vmem:[#allocation9 + $0xc0] sm:$0xff] }
  0x2f   :  { %v2015_v28 = vld [vmem:[#allocation9 + $0xc8] sm:$0xff]  ;;  %v2017_v29 = vld [vmem:[#allocation9 + $0xd0] sm:$0xff]  ;;  %v2019_v30 = vld [vmem:[#allocation9 + $0xd8] sm:$0xff] }
  0x30   :  { %v2021_v31 = vld [vmem:[#allocation9 + $0xe0] sm:$0xff]  ;;  %v2023_v32 = vld [vmem:[#allocation9 + $0xe8] sm:$0xff]  ;;  %v2025_v33 = vld [vmem:[#allocation9 + $0xf0] sm:$0xff] }
  0x31   :  { %v2027_v34 = vld [vmem:[#allocation9 + $0xf8] sm:$0xff]  ;;  %v2029_v35 = vld [vmem:[#allocation9 + $0x100] sm:$0xff]  ;;  %v2031_v36 = vld [vmem:[#allocation9 + $0x108] sm:$0xff] }
  0x32   :  { %v2033_v37 = vld [vmem:[#allocation9 + $0x110] sm:$0xff]  ;;  %v2035_v38 = vld [vmem:[#allocation9 + $0x118] sm:$0xff]  ;;  %v2037_v39 = vld [vmem:[#allocation9 + $0x120] sm:$0xff] }
  0x33   :  { %v2039_v40 = vld [vmem:[#allocation9 + $0x128] sm:$0xff]  ;;  %v2041_v41 = vld [vmem:[#allocation9 + $0x130] sm:$0xff]  ;;  %v2043_v42 = vld [vmem:[#allocation9 + $0x138] sm:$0xff] }
  0x34   :  { %v2045_v43 = vld [vmem:[#allocation9 + $0x140] sm:$0xff]  ;;  %v2047_v44 = vld [vmem:[#allocation9 + $0x148] sm:$0xff]  ;;  %v2049_v45 = vld [vmem:[#allocation9 + $0x150] sm:$0xff] }
  0x35   :  { %v2051_v46 = vld [vmem:[#allocation9 + $0x158] sm:$0xff]  ;;  %v2053_v47 = vld [vmem:[#allocation9 + $0x160] sm:$0xff]  ;;  %v2055_v48 = vld [vmem:[#allocation9 + $0x168] sm:$0xff] }
  0x36   :  { %2603 = vst [vmem:[#allocation17_spill] sm:$0xff] %v2053_v47  ;;  %2604 = vst [vmem:[#allocation18_spill] sm:$0xff] %v2055_v48  ;;  %v2057_v49 = vld [vmem:[#allocation9 + $0x170] sm:$0xff]  ;;  %v2059_v50 = vld [vmem:[#allocation9 + $0x178] sm:$0xff] }
  0x37   :  { %2605 = vst [vmem:[#allocation19_spill] sm:$0xff] %v2059_v50  ;;  %v2064_v51 = vld [vmem:[%s2587_s8] ss:$0 sm:$0xff]  ;;  %v72_v52 = vld [vmem:[%s2583_s4 + $0x8] sm:$0xff]  ;;  %v74_v56 = vld [vmem:[%s2583_s4 + $0x18] sm:$0xff] }
  0x38   :  { %2606 = vst [vmem:[#allocation20_spill] sm:$0xff] %v2064_v51  ;;  %v75_v53 = vld [vmem:[%s2583_s4 + $0x20] sm:$0xff]  ;;  %v78_v57 = vld [vmem:[%s2583_s4 + $0x38] sm:$0xff]  ;;  %v81_v58 = vld [vmem:[%s2583_s4 + $0x50] sm:$0xff] }
  0x39   :  { %v71_v54 = vld [vmem:[%s2583_s4] sm:$0xff]  ;;  %v1499_v55 = vpack.c.bf16 %v75_v53, %v72_v52  ;;  %v1503_v60 = vpack.c.bf16 %v81_v58, %v78_v57  ;;  %v77_v61 = vld [vmem:[%s2583_s4 + $0x30] sm:$0xff]  ;;  %v80_v62 = vld [vmem:[%s2583_s4 + $0x48] sm:$0xff] }
  0x3a   :  { %v1501_v59 = vpack.c.bf16 %v74_v56, %v71_v54  ;;  %v84_v63 = vld [vmem:[%s2583_s4 + $0x68] sm:$0xff]  ;;  %v87_v2 = vld [vmem:[%s2583_s4 + $0x80] sm:$0xff]  ;;  %v1505_v52 = vpack.c.bf16 %v80_v62, %v77_v61  ;;  %v86_v56 = vld [vmem:[%s2583_s4 + $0x78] sm:$0xff] }
  0x3b   :  { %1500 = vmatprep.subr.bf16.mxu0 %v1499_v55  ;;  %v83_v53 = vld [vmem:[%s2583_s4 + $0x60] sm:$0xff]  ;;  %v1507_v54 = vpack.c.bf16 %v87_v2, %v84_v63  ;;  %v73_v55 = vld [vmem:[%s2583_s4 + $0x10] sm:$0xff]  ;;  %v76_v57 = vld [vmem:[%s2583_s4 + $0x28] sm:$0xff] }
  0x3c   :  { %1502 = vmatpush1.bf16.msra.mxu0 %v1501_v59  ;;  %v90_v58 = vld [vmem:[%s2583_s4 + $0x98] sm:$0xff]  ;;  %v93_v59 = vld [vmem:[%s2583_s4 + $0xb0] sm:$0xff]  ;;  %v79_v61 = vld [vmem:[%s2583_s4 + $0x40] sm:$0xff]  ;;  %v1509_v63 = vpack.c.bf16 %v86_v56, %v83_v53 }
  0x3d   :  { %1504 = vmatprep.subr.bf16.mxu0 %v1503_v60  ;;  %v1531_v60 = vpack.c.bf16 %v76_v57, %v73_v55  ;;  %v82_v62 = vld [vmem:[%s2583_s4 + $0x58] sm:$0xff]  ;;  %v89_v2 = vld [vmem:[%s2583_s4 + $0x90] sm:$0xff]  ;;  %v1511_v51 = vpack.c.bf16 %v93_v59, %v90_v58  ;;  %v92_v55 = vld [vmem:[%s2583_s4 + $0xa8] sm:$0xff] }
  0x3e   :  { %v1535_v0 = vpack.c.bf16 %v82_v62, %v79_v61  ;;  %v85_v57 = vld [vmem:[%s2583_s4 + $0x70] sm:$0xff]  ;;  %v96_v53 = vld [vmem:[%s2583_s4 + $0xc8] sm:$0xff]  ;;  %v91_v58 = vld [vmem:[%s2583_s4 + $0xa0] sm:$0xff] }
  0x3f   :  { %1532 = vmatprep.subr.bf16.mxu1 %v1531_v60  ;;  %v94_v59 = vld [vmem:[%s2583_s4 + $0xb8] sm:$0xff]  ;;  %v95_v62 = vld [vmem:[%s2583_s4 + $0xc0] sm:$0xff]  ;;  %v108_v50 = vld [vmem:[%s2583_s4 + $0x128] sm:$0xff] }
  0x40   :  { %1506 = vmatpush1.bf16.msra.mxu0 %v1505_v52  ;;  %1534 = vmatpush3.bf16.msra.mxu1 %v1531_v60  ;;  %v88_v52 = vld [vmem:[%s2583_s4 + $0x88] sm:$0xff]  ;;  %v1513_v60 = vpack.c.bf16 %v92_v55, %v89_v2  ;;  %v63_v2 = vld [vmem:[%s2581_s2] sm:$0xff]  ;;  %v97_v55 = vld [vmem:[%s2583_s4 + $0xd0] sm:$0xff] }
  0x41   :  { %1508 = vmatprep.subr.bf16.mxu0 %v1507_v54  ;;  %v99_v54 = vld [vmem:[%s2583_s4 + $0xe0] sm:$0xff]  ;;  %1536 = vmatprep.subr.bf16.mxu1 %v1535_v0  ;;  %v1539_v56 = vpack.c.bf16 %v88_v52, %v85_v57  ;;  %v98_v57 = vld [vmem:[%s2583_s4 + $0xd8] sm:$0xff] }
  0x42   :  { %v1515_v61 = vpack.c.bf16 %v99_v54, %v96_v53  ;;  %v102_v52 = vld [vmem:[%s2583_s4 + $0xf8] sm:$0xff]  ;;  %1373 = vmatprep.mubr.f32.mxu1 %v63_v2  ;;  %v1517_v53 = vpack.c.bf16 %v98_v57, %v95_v62  ;;  %v103_v62 = vld [vmem:[%s2583_s4 + $0x100] sm:$0xff] }
  0x43   :  { %v106_v57 = vld [vmem:[%s2583_s4 + $0x118] sm:$0xff]  ;;  %v115_v47 = vld [vmem:[%s2583_s4 + $0x160] sm:$0xff] }
  0x44   :  { %1510 = vmatpush1.bf16.msra.mxu0 %v1509_v63  ;;  %1538 = vmatpush3.bf16.msra.mxu1 %v1535_v0  ;;  %v105_v63 = vld [vmem:[%s2583_s4 + $0x110] sm:$0xff]  ;;  %v100_v0 = vld [vmem:[%s2583_s4 + $0xe8] sm:$0xff] }
  0x45   :  { %1512 = vmatprep.subr.bf16.mxu0 %v1511_v51  ;;  %1540 = vmatprep.subr.bf16.mxu1 %v1539_v56  ;;  %v1543_v51 = vpack.c.bf16 %v94_v59, %v91_v58  ;;  %v1519_v54 = vpack.c.bf16 %v105_v63, %v102_v52  ;;  %v101_v58 = vld [vmem:[%s2583_s4 + $0xf0] sm:$0xff]  ;;  %v104_v59 = vld [vmem:[%s2583_s4 + $0x108] sm:$0xff]  ;;  %v107_v63 = vld [vmem:[%s2583_s4 + $0x120] sm:$0xff] }
  0x48   :  { %1514 = vmatpush1.bf16.msra.mxu0 %v1513_v60  ;;  %1542 = vmatpush3.bf16.msra.mxu1 %v1539_v56  ;;  %v111_v60 = vld [vmem:[%s2583_s4 + $0x140] sm:$0xff]  ;;  %v1521_v56 = vpack.c.bf16 %v104_v59, %v101_v58  ;;  %v112_v58 = vld [vmem:[%s2583_s4 + $0x148] sm:$0xff] }
  0x49   :  { %1516 = vmatprep.subr.bf16.mxu0 %v1515_v61  ;;  %1544 = vmatprep.subr.bf16.mxu1 %v1543_v51  ;;  %v1547_v61 = vpack.c.bf16 %v100_v0, %v97_v55  ;;  %v1523_v52 = vpack.c.bf16 %v111_v60, %v108_v50  ;;  %v110_v55 = vld [vmem:[%s2583_s4 + $0x138] sm:$0xff]  ;;  %v109_v50 = vld [vmem:[%s2583_s4 + $0x130] sm:$0xff] }
  0x4a   :  { %v114_v0 = vld [vmem:[%s2583_s4 + $0x158] sm:$0xff]  ;;  %v113_v60 = vld [vmem:[%s2583_s4 + $0x150] sm:$0xff] }
  0x4c   :  { %1518 = vmatpush1.bf16.msra.mxu0 %v1517_v53  ;;  %1546 = vmatpush3.bf16.msra.mxu1 %v1543_v51  ;;  %v117_v53 = vld [vmem:[%s2583_s4 + $0x170] sm:$0xff]  ;;  %v1525_v51 = vpack.c.bf16 %v110_v55, %v107_v63  ;;  %v64_v55 = vld [vmem:[%s2581_s2 + $0x8] sm:$0xff] }
  0x4d   :  { %1520 = vmatprep.subr.bf16.mxu0 %v1519_v54  ;;  %1548 = vmatprep.subr.bf16.mxu1 %v1547_v61  ;;  %v1551_v54 = vpack.c.bf16 %v106_v57, %v103_v62  ;;  %v1527_v59 = vpack.c.bf16 %v117_v53, %v114_v0  ;;  %v116_v62 = vld [vmem:[%s2583_s4 + $0x168] sm:$0xff]  ;;  %v1555_v57 = vpack.c.bf16 %v112_v58, %v109_v50  ;;  %v65_v0 = vld [vmem:[%s2581_s2 + $0x10] sm:$0xff]  ;;  %v70_v50 = vld [vmem:[%s2581_s2 + $0x38] sm:$0xff]  ;;  %v121_v58 = vlaneseq }
  0x4e   :  { %v68_v53 = vld [vmem:[%s2581_s2 + $0x28] sm:$0xff] }
  0x50   :  { %1522 = vmatpush1.bf16.msra.mxu0 %v1521_v56  ;;  %1550 = vmatpush3.bf16.msra.mxu1 %v1547_v61  ;;  %v118_v56 = vld [vmem:[%s2583_s4 + $0x178] sm:$0xff]  ;;  %v2607_v61 = vmov 0.0  }
  0x51   :  { %1524 = vmatprep.subr.bf16.mxu0 %v1523_v52  ;;  %1552 = vmatprep.subr.bf16.mxu1 %v1551_v54  ;;  %v1529_v52 = vpack.c.bf16 %v116_v62, %v113_v60  ;;  %v1559_v63 = vpack.c.bf16 %v118_v56, %v115_v47  ;;  %v66_v47 = vld [vmem:[%s2581_s2 + $0x18] sm:$0xff]  ;;  %v119_v60 = vld [vmem:[%s2586_s7] sm:$0x7] }
  0x54   :  { %1526 = vmatpush1.bf16.msra.mxu0 %v1525_v51  ;;  %1554 = vmatpush3.bf16.msra.mxu1 %v1551_v54  ;;  %v69_v54 = vld [vmem:[%s2581_s2 + $0x30] sm:$0xff]  ;;  %v2241_v51 = vshrl.u32 %v121_v58, 7 }
  0x55   :  { %1528 = vmatprep.subr.bf16.mxu0 %v1527_v59  ;;  %1556 = vmatprep.subr.bf16.mxu1 %v1555_v57 }
  0x56   :  { %2608 = vst [vmem:[#allocation21_spill] sm:$0xff] %v2241_v51  ;;  %v2594_v59 = vsub.s32 0, %v2241_v51  ;;  %v2593_v62 = vsub.s32 1, %v2241_v51 }
  0x58   :  { %1530 = vmatpush1.bf16.msra.mxu0 %v1529_v52  ;;  %1558 = vmatpush3.bf16.msra.mxu1 %v1555_v57  ;;  %v2250_v57 = vrot.slane %v119_v60, %v2594_v59  ;;  %v2254_v56 = vrot.slane %v119_v60, %v2593_v62  ;;  %v2597_v52 = vsub.s32 2, %v2241_v51 }
  0x59   :  { %1560 = vmatprep.subr.bf16.mxu1 %v1559_v63 }
  0x5b   :  { %201 = vmatmul.mubr.f32.vlgmr.msra.gmra.mrb[0].mxu0 %v63_v2  ;;  %v67_v2 = vld [vmem:[%s2581_s2 + $0x20] sm:$0xff] }
  0x5c   :  { %206 = vmatprep.mubr.f32.mxu0 %v2607_v61  ;;  %1562 = vmatpush3.bf16.msra.mxu1 %v1559_v63 }
  0x5f   :  { %207 = vmatmul.mubr.f32.gmra.mrb[2].mxu0 %v64_v55  ;;  %1374 = vmatmul.mubr.f32.vlgmr.msra.gmra.mrb[0].mxu1 %v64_v55 }
  0x60   :  { %212 = vmatprep.mubr.f32.mxu0 %v2607_v61  ;;  %1376 = vmatprep.mubr.f32.mxu1 %v65_v0 }
  0x63   :  { %213 = vmatmul.mubr.f32.gmra.mrb[4].mxu0 %v65_v0  ;;  %1377 = vmatmul.mubr.f32.gmra.mrb[2].mxu1 %v66_v47 }
  0x64   :  { %218 = vmatprep.mubr.f32.mxu0 %v2607_v61  ;;  %1379 = vmatprep.mubr.f32.mxu1 %v67_v2 }
  0x67   :  { %219 = vmatmul.mubr.f32.gmra.mrb[6].mxu0 %v66_v47  ;;  %1380 = vmatmul.mubr.f32.gmra.mrb[4].mxu1 %v68_v53  ;;  %v132_v47 = vrot.slane %v119_v60, %v2597_v52 }
  0x68   :  { %224 = vmatprep.mubr.f32.mxu0 %v2607_v61  ;;  %1382 = vmatprep.mubr.f32.mxu1 %v69_v54 }
  0x6b   :  { %225 = vmatmul.mubr.f32.gmra.mrb[8].mxu0 %v67_v2  ;;  %1383 = vmatmul.mubr.f32.gmra.mrb[6].mxu1 %v70_v50 }
  0x6c   :  { %230 = vmatprep.mubr.f32.mxu0 %v2607_v61 }
  0x6f   :  { %231 = vmatmul.mubr.f32.gmra.mrb[10].mxu0 %v68_v53 }
  0x70   :  { %236 = vmatprep.mubr.f32.mxu0 %v2607_v61 }
  0x73   :  { %237 = vmatmul.mubr.f32.gmra.mrb[12].mxu0 %v69_v54 }
  0x74   :  { %242 = vmatprep.mubr.f32.mxu0 %v2607_v61 }
  0x77   :  { %243 = vmatmul.mubr.f32.gmra.mrb[14].mxu0 %v70_v50 }
 0x12e   :  { %v202_v63 = vpop.f32.mrb[0].mxu0 }
 0x12f   :  { %v203_v61 = vadd.f32 %v202_v63, %v2250_v57  ;;  %v204_v55 = vpop.f32.mrb[1].mxu0 }
 0x130   :  { %v205_v0 = vadd.f32 %v204_v55, %v2254_v56 }
 0x131   :  { %354 = vst [vmem:[#allocation2] sm:$0xff] %v203_v61 }
 0x132   :  { %355 = vst [vmem:[#allocation2 + $0x8] sm:$0xff] %v205_v0  ;;  %v208_v2 = vpop.f32.mrb[2].mxu0  ;;  %v1375_v50 = vpop.f32.mrb[0].mxu1 }
 0x133   :  { %v209_v53 = vadd.f32 %v208_v2, %v2250_v57  ;;  %v210_v54 = vpop.f32.mrb[3].mxu0  ;;  %v321_v62 = vadd.f32 %v1375_v50, %v132_v47  ;;  %v315_v59 = vpop.f32.mrb[1].mxu1 }
 0x134   :  { %v211_v58 = vadd.f32 %v210_v54, %v2254_v56  ;;  %v316_v48 = vadd.f32 %v315_v59, %v132_v47 }
 0x135   :  { %357 = vst [vmem:[#allocation2 + $0x18] sm:$0xff] %v209_v53  ;;  %359 = vst [vmem:[#allocation2 + $0x28] sm:$0xff] %v321_v62 }
 0x136   :  { %358 = vst [vmem:[#allocation2 + $0x20] sm:$0xff] %v211_v58  ;;  %v214_v63 = vpop.f32.mrb[4].mxu0  ;;  %356 = vst [vmem:[#allocation2 + $0x10] sm:$0xff] %v316_v48  ;;  %v1378_v60 = vpop.f32.mrb[2].mxu1 }
 0x137   :  { %v215_v55 = vadd.f32 %v214_v63, %v2250_v57  ;;  %v216_v51 = vpop.f32.mrb[5].mxu0  ;;  %v331_v0 = vadd.f32 %v1378_v60, %v132_v47  ;;  %v325_v2 = vpop.f32.mrb[3].mxu1 }
 0x138   :  { %v217_v61 = vadd.f32 %v216_v51, %v2254_v56  ;;  %v326_v52 = vadd.f32 %v325_v2, %v132_v47 }
 0x139   :  { %360 = vst [vmem:[#allocation2 + $0x30] sm:$0xff] %v215_v55  ;;  %365 = vst [vmem:[#allocation2 + $0x58] sm:$0xff] %v331_v0 }
 0x13a   :  { %361 = vst [vmem:[#allocation2 + $0x38] sm:$0xff] %v217_v61  ;;  %v220_v54 = vpop.f32.mrb[6].mxu0  ;;  %362 = vst [vmem:[#allocation2 + $0x40] sm:$0xff] %v326_v52  ;;  %v1381_v50 = vpop.f32.mrb[4].mxu1 }
 0x13b   :  { %v221_v53 = vadd.f32 %v220_v54, %v2250_v57  ;;  %v222_v59 = vpop.f32.mrb[7].mxu0  ;;  %v341_v58 = vadd.f32 %v1381_v50, %v132_v47  ;;  %v335_v63 = vpop.f32.mrb[5].mxu1 }
 0x13c   :  { %v223_v62 = vadd.f32 %v222_v59, %v2254_v56  ;;  %v336_v48 = vadd.f32 %v335_v63, %v132_v47 }
 0x13d   :  { %363 = vst [vmem:[#allocation2 + $0x48] sm:$0xff] %v221_v53  ;;  %371 = vst [vmem:[#allocation2 + $0x88] sm:$0xff] %v341_v58 }
 0x13e   :  { %364 = vst [vmem:[#allocation2 + $0x50] sm:$0xff] %v223_v62  ;;  %v226_v51 = vpop.f32.mrb[8].mxu0  ;;  %368 = vst [vmem:[#allocation2 + $0x70] sm:$0xff] %v336_v48  ;;  %v1384_v61 = vpop.f32.mrb[6].mxu1 }
 0x13f   :  { %v227_v55 = vadd.f32 %v226_v51, %v2250_v57  ;;  %v228_v60 = vpop.f32.mrb[9].mxu0  ;;  %v351_v2 = vadd.f32 %v1384_v61, %v132_v47  ;;  %v345_v54 = vpop.f32.mrb[7].mxu1 }
 0x140   :  { %v229_v0 = vadd.f32 %v228_v60, %v2254_v56  ;;  %v346_v52 = vadd.f32 %v345_v54, %v132_v47 }
 0x141   :  { %366 = vst [vmem:[#allocation2 + $0x60] sm:$0xff] %v227_v55  ;;  %377 = vst [vmem:[#allocation2 + $0xb8] sm:$0xff] %v351_v2 }
 0x142   :  { %367 = vst [vmem:[#allocation2 + $0x68] sm:$0xff] %v229_v0  ;;  %v232_v59 = vpop.f32.mrb[10].mxu0  ;;  %374 = vst [vmem:[#allocation2 + $0xa0] sm:$0xff] %v346_v52 }
 0x143   :  { %v233_v53 = vadd.f32 %v232_v59, %v2250_v57  ;;  %v234_v50 = vpop.f32.mrb[11].mxu0 }
 0x144   :  { %v235_v62 = vadd.f32 %v234_v50, %v2254_v56 }
 0x145   :  { %369 = vst [vmem:[#allocation2 + $0x78] sm:$0xff] %v233_v53 }
 0x146   :  { %370 = vst [vmem:[#allocation2 + $0x80] sm:$0xff] %v235_v62  ;;  %v238_v58 = vpop.f32.mrb[12].mxu0 }
 0x147   :  { %v239_v63 = vadd.f32 %v238_v58, %v2250_v57  ;;  %v240_v48 = vpop.f32.mrb[13].mxu0 }
 0x148   :  { %v241_v51 = vadd.f32 %v240_v48, %v2254_v56  ;;  %1229 = sbr.rel (%p1243_p2) target bundleno = 627 (0x273), region = 93 }
 0x149   :  { %372 = vst [vmem:[#allocation2 + $0x90] sm:$0xff] %v239_v63 }
 0x14a   :  { %373 = vst [vmem:[#allocation2 + $0x98] sm:$0xff] %v241_v51  ;;  %v244_v47 = vpop.f32.mrb[14].mxu0 }
 0x14b   :  { %v245_v55 = vadd.f32 %v244_v47, %v2250_v57  ;;  %v246_v60 = vpop.f32.mrb[15].mxu0 }
 0x14c   :  { %v247_v61 = vadd.f32 %v246_v60, %v2254_v56 }
 0x14d   :  { %375 = vst [vmem:[#allocation2 + $0xa8] sm:$0xff] %v245_v55 }
 0x14e   :  { %376 = vst [vmem:[#allocation2 + $0xb0] sm:$0xff] %v247_v61 }
 0x14f LB: > { %v2609_v4 = vld [vmem:[#allocation15_spill] sm:$0xff]  ;;  %v2610_v3 = vld [vmem:[#allocation14_spill] sm:$0xff]  ;;  %v1567_v0 = vpack.c.bf16 %v1985_v13, %v1979_v10  ;;  %v2611_v5 = vld [vmem:[#allocation16_spill] sm:$0xff]  ;;  %v1569_v54 = vpack.c.bf16 %v1983_v12, %v1977_v9  ;;  %v1868_v52 = vmov 0.0|0.0   ;;  %v1571_v59 = vpack.c.bf16 %v1997_v19, %v1991_v16  ;;  %s1244_s24 = sshll.u32 %s1853_s23, 3  ;;  %s1853_s23 = sphi %s2282_s23, %s438_s23  }
 0x150   : > { %v1563_v57 = vpack.c.bf16 %v1973_v7, %v2609_v4  ;;  %v1565_v56 = vpack.c.bf16 %v1971_v6, %v2610_v3  ;;  %v1596_v2 = vpack.c.bf16 %v1975_v8, %v2611_v5  ;;  %1595 = vmatprep.subr.bf16.mxu1 %v1868_v52  ;;  %v1599_v53 = vpack.c.bf16 %v1987_v14, %v1981_v11  ;;  %s584_s25 = sshra.s32 %s1244_s24, 3  ;;  %s624_s28 = scalar_lea.vmem [#allocation3], %s1244_s24 }
 0x151   : > { %v1869_v50 = vmov 0.0   ;;  %vm1870_vm0 = vmmov 0   ;;  %v1573_v62 = vpack.c.bf16 %v1995_v18, %v1989_v15  ;;  %v1871_v58 = vmov 0   ;;  %s1257_s26 = smul.u32 24, %s584_s25 }
 0x152   : > { %1564 = vmatprep.subr.bf16.mxu0 %v1563_v57  ;;  %1597 = vmatpush3.bf16.msra.mxu1 %v1596_v2  ;;  %v610_v63 = vstv %s1853_s23  ;;  %v1575_v48 = vpack.c.bf16 %v2009_v25, %v2003_v22  ;;  %v1602_v51 = vpack.c.bf16 %v1999_v20, %v1993_v17  ;;  %v1577_v55 = vpack.c.bf16 %v2007_v24, %v2001_v21  ;;  %s438_s23 = sadd.s32 1, %s1853_s23  }
 0x153   : > { %1566 = vmatpush1.bf16.msra.mxu0 %v1565_v56  ;;  %1598 = vmatprep.subr.bf16.mxu1 %v1868_v52  ;;  %vm611_vm1 = vcmp.lt.s32.totalorder %v610_v63, %v1960_v1  ;;  %v1579_v60 = vpack.c.bf16 %v2021_v31, %v2015_v28  ;;  %v1605_v61 = vpack.c.bf16 %v2011_v26, %v2005_v23  ;;  %s588_s27 = scalar_lea.vmem [#allocation2], %s1257_s26  ;;  %p437_p3 = scmp.ge.s32.totalorder %s438_s23, %s2579_s0 }
 0x154   : > { %1568 = vmatprep.subr.bf16.mxu0 %v1567_v0  ;;  %507 = vmatprep.mubr.f32.mxu0 %v1869_v50  ;;  %v1246_v47 = vsel %vm611_vm1, 1.0, %v1869_v50  ;;  %v1581_v57 = vpack.c.bf16 %v2019_v30, %v2013_v27  ;;  %v1583_v56 = vpack.c.bf16 %v2033_v37, %v2027_v34  ;;  %v1608_v0 = vpack.c.bf16 %v2023_v32, %v2017_v29 }
 0x155   : > { %1417 = vmatprep.mubr.msk.f32.mxu1 %vm1870_vm0, %v1869_v50  ;;  %1777 = vset.pattern.permute.xlu0 %v1871_v58  ;;  %v1585_v2 = vpack.c.bf16 %v2031_v36, %v2025_v33  ;;  %v1591_v50 = vpack.c.bf16 %v2057_v49, %v2051_v46  ;;  %v2612_v58 = vld [vmem:[#allocation18_spill] sm:$0xff] }
 0x156   : > { %1600 = vmatpush3.bf16.msra.mxu1 %v1599_v53  ;;  %616 = vperm.xlu0 %1777, %v1246_v47   ;;  %v1589_v53 = vpack.c.bf16 %v2043_v42, %v2037_v39  ;;  %v1593_v63 = vpack.c.bf16 %v2612_v58, %v2049_v45  ;;  %v2615_v58 = vld [vmem:[#allocation20_spill] sm:$0xff] }
 0x157   : > { %1570 = vmatpush1.bf16.msra.mxu0 %v1569_v54  ;;  %1601 = vmatprep.subr.bf16.mxu1 %v1868_v52  ;;  %v1587_v54 = vpack.c.bf16 %v2045_v43, %v2039_v40 }
 0x158   : > { %1572 = vmatprep.subr.bf16.mxu0 %v1571_v59  ;;  %v1611_v59 = vpack.c.bf16 %v2035_v38, %v2029_v35 }
 0x15a   : > { %1603 = vmatpush3.bf16.msra.mxu1 %v1602_v51  ;;  %v2614_v51 = vld [vmem:[#allocation19_spill] sm:$0xff] }
 0x15b   : > { %1574 = vmatpush1.bf16.msra.mxu0 %v1573_v62  ;;  %1604 = vmatprep.subr.bf16.mxu1 %v1868_v52  ;;  %v1614_v62 = vpack.c.bf16 %v2047_v44, %v2041_v41 }
 0x15c   : > { %1576 = vmatprep.subr.bf16.mxu0 %v1575_v48  ;;  %v2613_v48 = vld [vmem:[#allocation17_spill] sm:$0xff] }
 0x15d   : > { %v1617_v47 = vpack.c.bf16 %v2614_v51, %v2613_v48  ;;  %v591_v51 = vld [vmem:[%s588_s27 + $0x10] sm:$0xff] }
 0x15e   : > { %1606 = vmatpush3.bf16.msra.mxu1 %v1605_v61  ;;  %v590_v61 = vld [vmem:[%s588_s27 + $0x8] sm:$0xff] }
 0x15f   : > { %1578 = vmatpush1.bf16.msra.mxu0 %v1577_v55  ;;  %1607 = vmatprep.subr.bf16.mxu1 %v1868_v52  ;;  %v442_v55 = vld [vmem:[#allocation4] sm:$0xff] }
 0x160   : > { %1580 = vmatprep.subr.bf16.mxu0 %v1579_v60  ;;  %v589_v60 = vld [vmem:[%s588_s27] sm:$0xff] }
 0x162   : > { %1609 = vmatpush3.bf16.msra.mxu1 %v1608_v0 }
 0x163   : > { %1582 = vmatpush1.bf16.msra.mxu0 %v1581_v57  ;;  %1610 = vmatprep.subr.bf16.mxu1 %v1868_v52 }
 0x164   : > { %1584 = vmatprep.subr.bf16.mxu0 %v1583_v56 }
 0x166   : > { %1612 = vmatpush3.bf16.msra.mxu1 %v1611_v59 }
 0x167   : > { %1586 = vmatpush1.bf16.msra.mxu0 %v1585_v2  ;;  %1613 = vmatprep.subr.bf16.mxu1 %v1868_v52 }
 0x168   : > { %1588 = vmatprep.subr.bf16.mxu0 %v1587_v54 }
 0x16a   : > { %1615 = vmatpush3.bf16.msra.mxu1 %v1614_v62 }
 0x16b   : > { %1590 = vmatpush1.bf16.msra.mxu0 %v1589_v53  ;;  %1616 = vmatprep.subr.bf16.mxu1 %v1868_v52 }
 0x16c   : > { %1592 = vmatprep.subr.bf16.mxu0 %v1591_v50 }
 0x16e   : > { %1618 = vmatpush3.bf16.msra.mxu1 %v1617_v47 }
 0x16f   : > { %1594 = vmatpush1.bf16.msra.mxu0 %v1593_v63 }
 0x171   : > { %1418 = vmatmul.mubr.f32.vlgmr.msra.gmra.mrb[0].mxu1 %v442_v55 }
 0x172   : > { %508 = vmatmul.mubr.f32.vlgmr.msra.gmra.mrb[0].mxu0 %v442_v55 }
 0x244   : > { %v580_v2 = vpop.f32.mrb[0].mxu1 }
 0x245   : > { %v509_v57 = vpop.f32.mrb[0].mxu0  ;;  %v1419_v59 = vpop.f32.mrb[1].mxu1  ;;  %v602_v63 = vadd.f32 %v2615_v58, %v580_v2 }
 0x246   : > { %v592_v56 = vadd.f32 %v589_v60, %v509_v57  ;;  %v511_v0 = vpop.f32.mrb[1].mxu0  ;;  %v617_v59 = vpop.permute.xlu0 %616 }
 0x247   : > { %v593_v54 = vadd.f32 %v590_v61, %v511_v0 }
 0x248   : > { %v594_v53 = vmul.f32 0.5, %v592_v56 }
 0x249   : > { %v595_v52 = vmul.f32 0.5, %v593_v54 }
 0x24a   : > { %1778 = vtanh.f32 %v594_v53 }
 0x24b   : > { %1780 = vtanh.f32 %v595_v52 }
 0x254   : > { %v1779_v50 = vpop.eup %1778 }
 0x255   : > { %v598_v62 = vmul.f32 0.5, %v1779_v50  ;;  %v1781_v3 = vpop.eup %1780 }
 0x256   : > { %v599_v60 = vmul.f32 0.5, %v1781_v3 }
 0x257   : > { %v600_v48 = vadd.f32 0.5, %v598_v62 }
 0x258   : > { %v601_v57 = vadd.f32 0.5, %v599_v60 }
 0x259   : > { %v603_v47 = vmul.f32 %v602_v63, %v600_v48 }
 0x25a   : > { %v606_v5 = vsub.f32 1.0, %v601_v57  ;;  %v608_v56 = vmul.f32 %v601_v57, %v442_v55 }
 0x25b   : > { %v604_v4 = vadd.f32 %v603_v47, %v591_v51 }
 0x25d   : > { %1782 = vtanh.f32 %v604_v4 }
 0x267   : > { %v1783_v61 = vpop.eup %1782 }
 0x268   : > { %v607_v0 = vmul.f32 %v1783_v61, %v606_v5 }
 0x26a   : > { %v609_v54 = vadd.f32 %v608_v56, %v607_v0 }
 0x26c   : > { %v619_v53 = vmul.f32 %v617_v59, %v609_v54  ;;  %v620_v52 = vsub.f32 %v609_v54, %v442_v55  ;;  %440 = sbr.rel (!%p437_p3) target bundleno = 335 (0x14f), region = 99 }
 0x26e   : > { %v621_v50 = vmul.f32 %v620_v52, %v617_v59  ;;  %625 = vst [vmem:[%s624_s28] sm:$0xff] %v619_v53 }
 0x270   : > { %v622_v2 = vadd.f32 %v621_v50, %v442_v55 }
 0x272   : > { %623 = vst [vmem:[#allocation4] sm:$0xff] %v622_v2 }
 0x273 PF:  { %v637_v4 = vld [vmem:[#allocation7 + $0x8] sm:$0xff]  ;;  %v640_v5 = vld [vmem:[#allocation7 + $0x20] sm:$0xff]  ;;  %v2616_v62 = vmov 0.0   ;;  %v639_v63 = vld [vmem:[#allocation7 + $0x18] sm:$0xff]  ;;  %s2497_s5 = smov (!%p1243_p2), 0  }
 0x274   :  { %766 = vmatprep.mubr.f32.mxu0 %v2616_v62  ;;  %v1619_v55 = vpack.c.bf16 %v640_v5, %v637_v4  ;;  %v636_v58 = vld [vmem:[#allocation7] sm:$0xff]  ;;  %v643_v48 = vld [vmem:[#allocation7 + $0x38] sm:$0xff]  ;;  %v646_v47 = vld [vmem:[#allocation7 + $0x50] sm:$0xff] }
 0x275   :  { %v1621_v51 = vpack.c.bf16 %v639_v63, %v636_v58  ;;  %v642_v60 = vld [vmem:[#allocation7 + $0x30] sm:$0xff]  ;;  %v645_v57 = vld [vmem:[#allocation7 + $0x48] sm:$0xff]  ;;  %v1623_v61 = vpack.c.bf16 %v646_v47, %v643_v48  ;;  %v652_v7 = vld [vmem:[#allocation7 + $0x80] sm:$0xff] }
 0x276   :  { %1620 = vmatprep.subr.bf16.mxu0 %v1619_v55  ;;  %v649_v6 = vld [vmem:[#allocation7 + $0x68] sm:$0xff]  ;;  %v1625_v8 = vpack.c.bf16 %v645_v57, %v642_v60  ;;  %v648_v10 = vld [vmem:[#allocation7 + $0x60] sm:$0xff]  ;;  %v651_v11 = vld [vmem:[#allocation7 + $0x78] sm:$0xff] }
 0x277   :  { %1622 = vmatpush1.bf16.msra.mxu0 %v1621_v51  ;;  %v1627_v9 = vpack.c.bf16 %v652_v7, %v649_v6  ;;  %v638_v12 = vld [vmem:[#allocation7 + $0x10] sm:$0xff]  ;;  %v655_v13 = vld [vmem:[#allocation7 + $0x98] sm:$0xff]  ;;  %v641_v15 = vld [vmem:[#allocation7 + $0x28] sm:$0xff]  ;;  %v1629_v18 = vpack.c.bf16 %v651_v11, %v648_v10 }
 0x278   :  { %1624 = vmatprep.subr.bf16.mxu0 %v1623_v61  ;;  %v658_v14 = vld [vmem:[#allocation7 + $0xb0] sm:$0xff]  ;;  %v1651_v16 = vpack.c.bf16 %v641_v15, %v638_v12  ;;  %v644_v17 = vld [vmem:[#allocation7 + $0x40] sm:$0xff]  ;;  %v647_v19 = vld [vmem:[#allocation7 + $0x58] sm:$0xff] }
 0x279   :  { %v626_v3 = vld [vmem:[#allocation4] sm:$0xff]  ;;  %v1631_v20 = vpack.c.bf16 %v658_v14, %v655_v13  ;;  %v654_v21 = vld [vmem:[#allocation7 + $0x90] sm:$0xff]  ;;  %v657_v22 = vld [vmem:[#allocation7 + $0xa8] sm:$0xff]  ;;  %v1655_v23 = vpack.c.bf16 %v647_v19, %v644_v17 }
 0x27a   :  { %627 = vst [vmem:[%s2589_s10] sm:$0xff] %v626_v3  ;;  %1652 = vmatprep.subr.bf16.mxu1 %v1651_v16  ;;  %v650_v24 = vld [vmem:[#allocation7 + $0x70] sm:$0xff]  ;;  %v661_v25 = vld [vmem:[#allocation7 + $0xc8] sm:$0xff]  ;;  %v664_v26 = vld [vmem:[#allocation7 + $0xe0] sm:$0xff]  ;;  %v1633_v29 = vpack.c.bf16 %v657_v22, %v654_v21 }
 0x27b   :  { %1626 = vmatpush1.bf16.msra.mxu0 %v1625_v8  ;;  %1654 = vmatpush3.bf16.msra.mxu1 %v1651_v16  ;;  %v653_v27 = vld [vmem:[#allocation7 + $0x88] sm:$0xff]  ;;  %v656_v30 = vld [vmem:[#allocation7 + $0xa0] sm:$0xff]  ;;  %v659_v31 = vld [vmem:[#allocation7 + $0xb8] sm:$0xff]  ;;  %v1635_v32 = vpack.c.bf16 %v664_v26, %v661_v25 }
 0x27c   :  { %1628 = vmatprep.subr.bf16.mxu0 %v1627_v9  ;;  %1656 = vmatprep.subr.bf16.mxu1 %v1655_v23  ;;  %v1659_v28 = vpack.c.bf16 %v653_v27, %v650_v24  ;;  %v660_v33 = vld [vmem:[#allocation7 + $0xc0] sm:$0xff]  ;;  %v663_v34 = vld [vmem:[#allocation7 + $0xd8] sm:$0xff]  ;;  %v670_v36 = vld [vmem:[#allocation7 + $0x110] sm:$0xff]  ;;  %v1663_v38 = vpack.c.bf16 %v659_v31, %v656_v30 }
 0x27d   :  { %v667_v35 = vld [vmem:[#allocation7 + $0xf8] sm:$0xff]  ;;  %v1637_v39 = vpack.c.bf16 %v663_v34, %v660_v33  ;;  %v662_v40 = vld [vmem:[#allocation7 + $0xd0] sm:$0xff]  ;;  %v665_v41 = vld [vmem:[#allocation7 + $0xe8] sm:$0xff] }
 0x27e   :  { %v628_v37 = vld [vmem:[#allocation3] sm:$0xff]  ;;  %v1639_v42 = vpack.c.bf16 %v670_v36, %v667_v35  ;;  %v666_v43 = vld [vmem:[#allocation7 + $0xf0] sm:$0xff]  ;;  %v669_v44 = vld [vmem:[#allocation7 + $0x108] sm:$0xff]  ;;  %v1667_v49 = vpack.c.bf16 %v665_v41, %v662_v40 }
 0x27f   :  { %1630 = vmatpush1.bf16.msra.mxu0 %v1629_v18  ;;  %1658 = vmatpush3.bf16.msra.mxu1 %v1655_v23  ;;  %v673_v45 = vld [vmem:[#allocation7 + $0x128] sm:$0xff]  ;;  %v676_v46 = vld [vmem:[#allocation7 + $0x140] sm:$0xff]  ;;  %v1641_v0 = vpack.c.bf16 %v669_v44, %v666_v43  ;;  %v671_v59 = vld [vmem:[#allocation7 + $0x118] sm:$0xff] }
 0x280   :  { %1632 = vmatprep.subr.bf16.mxu0 %v1631_v20  ;;  %1660 = vmatprep.subr.bf16.mxu1 %v1659_v28  ;;  %v668_v56 = vld [vmem:[#allocation7 + $0x100] sm:$0xff]  ;;  %v1643_v54 = vpack.c.bf16 %v676_v46, %v673_v45  ;;  %v675_v52 = vld [vmem:[#allocation7 + $0x138] sm:$0xff]  ;;  %v682_v2 = vld [vmem:[#allocation7 + $0x170] sm:$0xff] }
 0x281   :  { %1452 = vmatprep.mubr.f32.mxu1 %v628_v37  ;;  %v672_v53 = vld [vmem:[#allocation7 + $0x120] sm:$0xff]  ;;  %v679_v50 = vld [vmem:[#allocation7 + $0x158] sm:$0xff]  ;;  %v1671_v3 = vpack.c.bf16 %v671_v59, %v668_v56  ;;  %v674_v5 = vld [vmem:[#allocation7 + $0x130] sm:$0xff] }
 0x282   :  { %v1645_v4 = vpack.c.bf16 %v675_v52, %v672_v53  ;;  %v677_v55 = vld [vmem:[#allocation7 + $0x148] sm:$0xff]  ;;  %v1647_v58 = vpack.c.bf16 %v682_v2, %v679_v50  ;;  %v678_v63 = vld [vmem:[#allocation7 + $0x150] sm:$0xff]  ;;  %v680_v60 = vld [vmem:[#allocation7 + $0x160] sm:$0xff] }
 0x283   :  { %1634 = vmatpush1.bf16.msra.mxu0 %v1633_v29  ;;  %1662 = vmatpush3.bf16.msra.mxu1 %v1659_v28  ;;  %v681_v48 = vld [vmem:[#allocation7 + $0x168] sm:$0xff]  ;;  %v1675_v51 = vpack.c.bf16 %v677_v55, %v674_v5  ;;  %v683_v57 = vld [vmem:[#allocation7 + $0x178] sm:$0xff]  ;;  %v629_v6 = vld [vmem:[#allocation3 + $0x8] sm:$0xff] }
 0x284   :  { %1636 = vmatprep.subr.bf16.mxu0 %v1635_v32  ;;  %1664 = vmatprep.subr.bf16.mxu1 %v1663_v38  ;;  %v1649_v47 = vpack.c.bf16 %v681_v48, %v678_v63  ;;  %v1679_v61 = vpack.c.bf16 %v683_v57, %v680_v60  ;;  %v630_v7 = vld [vmem:[#allocation3 + $0x10] sm:$0xff]  ;;  %v631_v8 = vld [vmem:[#allocation3 + $0x18] sm:$0xff]  ;;  %v632_v9 = vld [vmem:[#allocation3 + $0x20] sm:$0xff] }
 0x285   :  { %v633_v10 = vld [vmem:[#allocation3 + $0x28] sm:$0xff]  ;;  %v634_v11 = vld [vmem:[#allocation3 + $0x30] sm:$0xff]  ;;  %v635_v12 = vld [vmem:[#allocation3 + $0x38] sm:$0xff] }
 0x286   :  { %v1248_v13 = vld [vmem:[%s2582_s3 + $0x8] sm:$0xff]  ;;  %v2365_v15 = vld [vmem:[#allocation9 + $0x188] sm:$0xff]  ;;  %v2367_v16 = vld [vmem:[#allocation9 + $0x190] sm:$0xff] }
 0x287   :  { %1638 = vmatpush1.bf16.msra.mxu0 %v1637_v39  ;;  %1666 = vmatpush3.bf16.msra.mxu1 %v1663_v38  ;;  %946 = vst [vmem:[#allocation4] sm:$0xff] %v1248_v13  ;;  %v2363_v14 = vld [vmem:[#allocation9 + $0x180] sm:$0xff]  ;;  %v2369_v17 = vld [vmem:[#allocation9 + $0x198] sm:$0xff]  ;;  %v2373_v19 = vld [vmem:[#allocation9 + $0x1a8] sm:$0xff] }
 0x288   :  { %1640 = vmatprep.subr.bf16.mxu0 %v1639_v42  ;;  %1668 = vmatprep.subr.bf16.mxu1 %v1667_v49  ;;  %v2371_v18 = vld [vmem:[#allocation9 + $0x1a0] sm:$0xff]  ;;  %v2375_v20 = vld [vmem:[#allocation9 + $0x1b0] sm:$0xff]  ;;  %v2381_v22 = vld [vmem:[#allocation9 + $0x1c8] sm:$0xff] }
 0x289   :  { %v2379_v21 = vld [vmem:[#allocation9 + $0x1c0] sm:$0xff]  ;;  %v2383_v23 = vld [vmem:[#allocation9 + $0x1d0] sm:$0xff]  ;;  %v2385_v24 = vld [vmem:[#allocation9 + $0x1d8] sm:$0xff] }
 0x28a   :  { %v2387_v25 = vld [vmem:[#allocation9 + $0x1e0] sm:$0xff]  ;;  %v2389_v26 = vld [vmem:[#allocation9 + $0x1e8] sm:$0xff]  ;;  %v2391_v27 = vld [vmem:[#allocation9 + $0x1f0] sm:$0xff] }
 0x28b   :  { %1642 = vmatpush1.bf16.msra.mxu0 %v1641_v0  ;;  %1670 = vmatpush3.bf16.msra.mxu1 %v1667_v49  ;;  %v2393_v28 = vld [vmem:[#allocation9 + $0x1f8] sm:$0xff]  ;;  %v2395_v29 = vld [vmem:[#allocation9 + $0x200] sm:$0xff]  ;;  %v2397_v30 = vld [vmem:[#allocation9 + $0x208] sm:$0xff] }
 0x28c   :  { %1644 = vmatprep.subr.bf16.mxu0 %v1643_v54  ;;  %1672 = vmatprep.subr.bf16.mxu1 %v1671_v3  ;;  %v2399_v31 = vld [vmem:[#allocation9 + $0x210] sm:$0xff]  ;;  %v2401_v32 = vld [vmem:[#allocation9 + $0x218] sm:$0xff]  ;;  %v2403_v33 = vld [vmem:[#allocation9 + $0x220] sm:$0xff] }
 0x28d   :  { %v2405_v34 = vld [vmem:[#allocation9 + $0x228] sm:$0xff]  ;;  %v2407_v35 = vld [vmem:[#allocation9 + $0x230] sm:$0xff]  ;;  %v2409_v36 = vld [vmem:[#allocation9 + $0x238] sm:$0xff] }
 0x28e   :  { %v2413_v38 = vld [vmem:[#allocation9 + $0x248] sm:$0xff]  ;;  %v2415_v39 = vld [vmem:[#allocation9 + $0x250] sm:$0xff]  ;;  %v2417_v40 = vld [vmem:[#allocation9 + $0x258] sm:$0xff] }
 0x28f   :  { %1646 = vmatpush1.bf16.msra.mxu0 %v1645_v4  ;;  %1674 = vmatpush3.bf16.msra.mxu1 %v1671_v3  ;;  %v2419_v41 = vld [vmem:[#allocation9 + $0x260] sm:$0xff]  ;;  %v2421_v42 = vld [vmem:[#allocation9 + $0x268] sm:$0xff]  ;;  %v2423_v43 = vld [vmem:[#allocation9 + $0x270] sm:$0xff] }
 0x290   :  { %1648 = vmatprep.subr.bf16.mxu0 %v1647_v58  ;;  %1676 = vmatprep.subr.bf16.mxu1 %v1675_v51  ;;  %v2425_v44 = vld [vmem:[#allocation9 + $0x278] sm:$0xff]  ;;  %v2427_v45 = vld [vmem:[#allocation9 + $0x280] sm:$0xff]  ;;  %v2429_v46 = vld [vmem:[#allocation9 + $0x288] sm:$0xff] }
 0x291   :  { %v2431_v49 = vld [vmem:[#allocation9 + $0x290] sm:$0xff]  ;;  %v2433_v0 = vld [vmem:[#allocation9 + $0x298] sm:$0xff]  ;;  %v2435_v56 = vld [vmem:[#allocation9 + $0x2a0] sm:$0xff] }
 0x292   :  { %2617 = vst [vmem:[#allocation14_spill] sm:$0xff] %v2433_v0  ;;  %v2437_v59 = vld [vmem:[#allocation9 + $0x2a8] sm:$0xff]  ;;  %v2439_v54 = vld [vmem:[#allocation9 + $0x2b0] sm:$0xff]  ;;  %v2441_v53 = vld [vmem:[#allocation9 + $0x2b8] sm:$0xff] }
 0x293   :  { %1650 = vmatpush1.bf16.msra.mxu0 %v1649_v47  ;;  %1678 = vmatpush3.bf16.msra.mxu1 %v1675_v51  ;;  %v2443_v52 = vld [vmem:[#allocation9 + $0x2c0] sm:$0xff]  ;;  %v2445_v50 = vld [vmem:[#allocation9 + $0x2c8] sm:$0xff]  ;;  %v2447_v2 = vld [vmem:[#allocation9 + $0x2d0] sm:$0xff] }
 0x294   :  { %1680 = vmatprep.subr.bf16.mxu1 %v1679_v61  ;;  %2618 = vst [vmem:[#allocation15_spill] sm:$0xff] %v2447_v2  ;;  %v2449_v3 = vld [vmem:[#allocation9 + $0x2d8] sm:$0xff]  ;;  %v2451_v4 = vld [vmem:[#allocation9 + $0x2e0] sm:$0xff]  ;;  %v2453_v5 = vld [vmem:[#allocation9 + $0x2e8] sm:$0xff] }
 0x295   :  { %2619 = vst [vmem:[#allocation16_spill] sm:$0xff] %v2451_v4  ;;  %2620 = vst [vmem:[#allocation17_spill] sm:$0xff] %v2453_v5  ;;  %v2455_v55 = vld [vmem:[#allocation9 + $0x2f0] sm:$0xff]  ;;  %v2457_v58 = vld [vmem:[#allocation9 + $0x2f8] sm:$0xff] }
 0x296   :  { %767 = vmatmul.mubr.f32.vlgmr.msra.gmra.mrb[0].mxu0 %v628_v37  ;;  %v2411_v37 = vld [vmem:[#allocation9 + $0x240] sm:$0xff]  ;;  %2621 = vst [vmem:[#allocation18_spill] sm:$0xff] %v2457_v58  ;;  %v2462_v63 = vld [vmem:[%s2587_s8 + $0x1] ss:$0 sm:$0xff]  ;;  %v1247_v48 = vld [vmem:[%s2586_s7 + $0x3] sm:$0x7] }
 0x297   :  { %772 = vmatprep.mubr.f32.mxu0 %v2616_v62  ;;  %1682 = vmatpush3.bf16.msra.mxu1 %v1679_v61  ;;  %2622 = vst [vmem:[#allocation19_spill] sm:$0xff] %v2462_v63  ;;  %v2623_v51 = vld [vmem:[#allocation21_spill] sm:$0xff] }
 0x298   :  { %v2624_v47 = vsub.s32 0, %v2623_v51  ;;  %v2625_v57 = vsub.s32 1, %v2623_v51 }
 0x29a   :  { %773 = vmatmul.mubr.f32.gmra.mrb[2].mxu0 %v629_v6  ;;  %1453 = vmatmul.mubr.f32.vlgmr.msra.gmra.mrb[0].mxu1 %v629_v6  ;;  %v2469_v60 = vrot.slane %v1247_v48, %v2624_v47  ;;  %v2473_v61 = vrot.slane %v1247_v48, %v2625_v57 }
 0x29b   :  { %778 = vmatprep.mubr.f32.mxu0 %v2616_v62  ;;  %1455 = vmatprep.mubr.f32.mxu1 %v630_v7 }
 0x29e   :  { %779 = vmatmul.mubr.f32.gmra.mrb[4].mxu0 %v630_v7  ;;  %1456 = vmatmul.mubr.f32.gmra.mrb[2].mxu1 %v631_v8 }
 0x29f   :  { %784 = vmatprep.mubr.f32.mxu0 %v2616_v62  ;;  %1458 = vmatprep.mubr.f32.mxu1 %v632_v9 }
 0x2a2   :  { %785 = vmatmul.mubr.f32.gmra.mrb[6].mxu0 %v631_v8  ;;  %1459 = vmatmul.mubr.f32.gmra.mrb[4].mxu1 %v633_v10 }
 0x2a3   :  { %790 = vmatprep.mubr.f32.mxu0 %v2616_v62  ;;  %1461 = vmatprep.mubr.f32.mxu1 %v634_v11 }
 0x2a6   :  { %791 = vmatmul.mubr.f32.gmra.mrb[8].mxu0 %v632_v9  ;;  %1462 = vmatmul.mubr.f32.gmra.mrb[6].mxu1 %v635_v12 }
 0x2a7   :  { %796 = vmatprep.mubr.f32.mxu0 %v2616_v62 }
 0x2aa   :  { %797 = vmatmul.mubr.f32.gmra.mrb[10].mxu0 %v633_v10  ;;  %v2626_v10 = vsub.s32 2, %v2623_v51 }
 0x2ab   :  { %802 = vmatprep.mubr.f32.mxu0 %v2616_v62 }
 0x2ae   :  { %803 = vmatmul.mubr.f32.gmra.mrb[12].mxu0 %v634_v11  ;;  %v698_v11 = vrot.slane %v1247_v48, %v2626_v10 }
 0x2af   :  { %808 = vmatprep.mubr.f32.mxu0 %v2616_v62  ;;  %v2377_v62 = vld [vmem:[#allocation9 + $0x1b8] sm:$0xff] }
 0x2b2   :  { %809 = vmatmul.mubr.f32.gmra.mrb[14].mxu0 %v635_v12 }
 0x369   :  { %v768_v6 = vpop.f32.mrb[0].mxu0 }
 0x36a   :  { %v769_v7 = vadd.f32 %v768_v6, %v2469_v60  ;;  %v770_v8 = vpop.f32.mrb[1].mxu0 }
 0x36b   :  { %v771_v9 = vadd.f32 %v770_v8, %v2473_v61 }
 0x36c   :  { %920 = vst [vmem:[#allocation2] sm:$0xff] %v769_v7 }
 0x36d   :  { %921 = vst [vmem:[#allocation2 + $0x8] sm:$0xff] %v771_v9  ;;  %v774_v12 = vpop.f32.mrb[2].mxu0  ;;  %v1454_v58 = vpop.f32.mrb[0].mxu1 }
 0x36e   :  { %v775_v13 = vadd.f32 %v774_v12, %v2469_v60  ;;  %v776_v47 = vpop.f32.mrb[3].mxu0  ;;  %v887_v57 = vadd.f32 %v1454_v58, %v698_v11  ;;  %v881_v4 = vpop.f32.mrb[1].mxu1 }
 0x36f   :  { %v777_v63 = vadd.f32 %v776_v47, %v2473_v61  ;;  %v882_v5 = vadd.f32 %v881_v4, %v698_v11 }
 0x370   :  { %923 = vst [vmem:[#allocation2 + $0x18] sm:$0xff] %v775_v13  ;;  %925 = vst [vmem:[#allocation2 + $0x28] sm:$0xff] %v887_v57 }
 0x371   :  { %924 = vst [vmem:[#allocation2 + $0x20] sm:$0xff] %v777_v63  ;;  %v780_v6 = vpop.f32.mrb[4].mxu0  ;;  %922 = vst [vmem:[#allocation2 + $0x10] sm:$0xff] %v882_v5  ;;  %v1457_v51 = vpop.f32.mrb[2].mxu1 }
 0x372   :  { %v781_v8 = vadd.f32 %v780_v6, %v2469_v60  ;;  %v782_v7 = vpop.f32.mrb[5].mxu0  ;;  %v897_v9 = vadd.f32 %v1457_v51, %v698_v11  ;;  %v891_v10 = vpop.f32.mrb[3].mxu1 }
 0x373   :  { %v783_v48 = vadd.f32 %v782_v7, %v2473_v61  ;;  %v892_v47 = vadd.f32 %v891_v10, %v698_v11 }
 0x374   :  { %926 = vst [vmem:[#allocation2 + $0x30] sm:$0xff] %v781_v8  ;;  %931 = vst [vmem:[#allocation2 + $0x58] sm:$0xff] %v897_v9 }
 0x375   :  { %927 = vst [vmem:[#allocation2 + $0x38] sm:$0xff] %v783_v48  ;;  %v786_v12 = vpop.f32.mrb[6].mxu0  ;;  %928 = vst [vmem:[#allocation2 + $0x40] sm:$0xff] %v892_v47  ;;  %v1460_v63 = vpop.f32.mrb[4].mxu1 }
 0x376   :  { %v787_v58 = vadd.f32 %v786_v12, %v2469_v60  ;;  %v788_v13 = vpop.f32.mrb[7].mxu0  ;;  %v907_v57 = vadd.f32 %v1460_v63, %v698_v11  ;;  %v901_v6 = vpop.f32.mrb[5].mxu1 }
 0x377   :  { %v789_v4 = vadd.f32 %v788_v13, %v2473_v61  ;;  %v902_v7 = vadd.f32 %v901_v6, %v698_v11 }
 0x378   :  { %929 = vst [vmem:[#allocation2 + $0x48] sm:$0xff] %v787_v58  ;;  %937 = vst [vmem:[#allocation2 + $0x88] sm:$0xff] %v907_v57 }
 0x379   :  { %930 = vst [vmem:[#allocation2 + $0x50] sm:$0xff] %v789_v4  ;;  %v792_v5 = vpop.f32.mrb[8].mxu0  ;;  %934 = vst [vmem:[#allocation2 + $0x70] sm:$0xff] %v902_v7  ;;  %v1463_v10 = vpop.f32.mrb[6].mxu1 }
 0x37a   :  { %v793_v8 = vadd.f32 %v792_v5, %v2469_v60  ;;  %v794_v51 = vpop.f32.mrb[9].mxu0  ;;  %v917_v9 = vadd.f32 %v1463_v10, %v698_v11  ;;  %v911_v12 = vpop.f32.mrb[7].mxu1 }
 0x37b   :  { %v795_v48 = vadd.f32 %v794_v51, %v2473_v61  ;;  %v912_v13 = vadd.f32 %v911_v12, %v698_v11 }
 0x37c   :  { %932 = vst [vmem:[#allocation2 + $0x60] sm:$0xff] %v793_v8  ;;  %943 = vst [vmem:[#allocation2 + $0xb8] sm:$0xff] %v917_v9 }
 0x37d   :  { %933 = vst [vmem:[#allocation2 + $0x68] sm:$0xff] %v795_v48  ;;  %v798_v47 = vpop.f32.mrb[10].mxu0  ;;  %940 = vst [vmem:[#allocation2 + $0xa0] sm:$0xff] %v912_v13 }
 0x37e   :  { %v799_v58 = vadd.f32 %v798_v47, %v2469_v60  ;;  %v800_v63 = vpop.f32.mrb[11].mxu0 }
 0x37f   :  { %v801_v4 = vadd.f32 %v800_v63, %v2473_v61 }
 0x380   :  { %935 = vst [vmem:[#allocation2 + $0x78] sm:$0xff] %v799_v58 }
 0x381   :  { %936 = vst [vmem:[#allocation2 + $0x80] sm:$0xff] %v801_v4  ;;  %v804_v57 = vpop.f32.mrb[12].mxu0 }
 0x382   :  { %v805_v6 = vadd.f32 %v804_v57, %v2469_v60  ;;  %v806_v5 = vpop.f32.mrb[13].mxu0 }
 0x383   :  { %v807_v7 = vadd.f32 %v806_v5, %v2473_v61  ;;  %1234 = sbr.rel (%p1243_p2) target bundleno = 1197 (0x4ad), region = 104 }
 0x384   :  { %938 = vst [vmem:[#allocation2 + $0x90] sm:$0xff] %v805_v6 }
 0x385   :  { %939 = vst [vmem:[#allocation2 + $0x98] sm:$0xff] %v807_v7  ;;  %v810_v8 = vpop.f32.mrb[14].mxu0 }
 0x386   :  { %v811_v11 = vadd.f32 %v810_v8, %v2469_v60  ;;  %v812_v51 = vpop.f32.mrb[15].mxu0 }
 0x387   :  { %v813_v48 = vadd.f32 %v812_v51, %v2473_v61 }
 0x388   :  { %941 = vst [vmem:[#allocation2 + $0xa8] sm:$0xff] %v811_v11 }
 0x389   :  { %942 = vst [vmem:[#allocation2 + $0xb0] sm:$0xff] %v813_v48 }
 0x38a LB: > { %v1683_v60 = vpack.c.bf16 %v2371_v18, %v2365_v15  ;;  %v1685_v61 = vpack.c.bf16 %v2369_v17, %v2363_v14  ;;  %v1687_v10 = vpack.c.bf16 %v2383_v23, %v2377_v62  ;;  %v1716_v9 = vpack.c.bf16 %v2373_v19, %v2367_v16  ;;  %v2627_v1 = vld [vmem:[#allocation13_spill] sm:$0xff]  ;;  %v2628_v0 = vld [vmem:[#allocation14_spill] sm:$0xff]  ;;  %v2629_v2 = vld [vmem:[#allocation15_spill] sm:$0xff]  ;;  %s1252_s14 = sshll.u32 %s1857_s5, 3  ;;  %s1857_s5 = sphi %s2497_s5, %s1007_s5  }
 0x38b   : > { %v1689_v12 = vpack.c.bf16 %v2381_v22, %v2375_v20  ;;  %v1872_v47 = vmov 0.0|0.0   ;;  %v1691_v13 = vpack.c.bf16 %v2395_v29, %v2389_v26  ;;  %v1719_v58 = vpack.c.bf16 %v2385_v24, %v2379_v21  ;;  %s1153_s18 = sshra.s32 %s1252_s14, 3  ;;  %s1193_s1 = scalar_lea.vmem %s2588_s9, %s1252_s14 }
 0x38c   : > { %1684 = vmatprep.subr.bf16.mxu0 %v1683_v60  ;;  %1715 = vmatprep.subr.bf16.mxu1 %v1872_v47  ;;  %v1873_v63 = vmov 0.0   ;;  %vm1874_vm2 = vmmov 0   ;;  %v1693_v4 = vpack.c.bf16 %v2393_v28, %v2387_v25  ;;  %v1875_v57 = vmov 0   ;;  %s1258_s19 = smul.u32 24, %s1153_s18 }
 0x38d   : > { %1686 = vmatpush1.bf16.msra.mxu0 %v1685_v61  ;;  %1717 = vmatpush3.bf16.msra.mxu1 %v1716_v9  ;;  %v1179_v6 = vstv %s1857_s5  ;;  %v1695_v5 = vpack.c.bf16 %v2407_v35, %v2401_v32  ;;  %v1722_v7 = vpack.c.bf16 %v2397_v30, %v2391_v27  ;;  %v1697_v11 = vpack.c.bf16 %v2405_v34, %v2399_v31  ;;  %s1007_s5 = sadd.s32 1, %s1857_s5  }
 0x38e   : > { %1688 = vmatprep.subr.bf16.mxu0 %v1687_v10  ;;  %1718 = vmatprep.subr.bf16.mxu1 %v1872_v47  ;;  %vm1180_vm3 = vcmp.lt.s32.totalorder %v1179_v6, %v2627_v1  ;;  %v1699_v51 = vpack.c.bf16 %v2419_v41, %v2413_v38  ;;  %v1725_v48 = vpack.c.bf16 %v2409_v36, %v2403_v33  ;;  %s1157_s20 = scalar_lea.vmem [#allocation2], %s1258_s19  ;;  %p1006_p4 = scmp.ge.s32.totalorder %s1007_s5, %s2579_s0 }
 0x38f   : > { %1076 = vmatprep.mubr.f32.mxu0 %v1873_v63  ;;  %1496 = vmatprep.mubr.msk.f32.mxu1 %vm1874_vm2, %v1873_v63  ;;  %v1254_v8 = vsel %vm1180_vm3, 1.0, %v1873_v63  ;;  %v1701_v60 = vpack.c.bf16 %v2417_v40, %v2411_v37  ;;  %v1703_v61 = vpack.c.bf16 %v2431_v49, %v2425_v44  ;;  %v1728_v10 = vpack.c.bf16 %v2421_v42, %v2415_v39 }
 0x390   : > { %1784 = vset.pattern.permute.xlu0 %v1875_v57  ;;  %v1705_v9 = vpack.c.bf16 %v2429_v46, %v2423_v43  ;;  %v1711_v63 = vpack.c.bf16 %v2455_v55, %v2449_v3  ;;  %v2630_v57 = vld [vmem:[#allocation17_spill] sm:$0xff] }
 0x391   : > { %1690 = vmatpush1.bf16.msra.mxu0 %v1689_v12  ;;  %1720 = vmatpush3.bf16.msra.mxu1 %v1719_v58  ;;  %v1707_v12 = vpack.c.bf16 %v2443_v52, %v2437_v59  ;;  %v1709_v58 = vpack.c.bf16 %v2441_v53, %v2435_v56  ;;  %v1713_v6 = vpack.c.bf16 %v2630_v57, %v2629_v2  ;;  %v2633_v57 = vld [vmem:[#allocation19_spill] sm:$0xff] }
 0x392   : > { %1692 = vmatprep.subr.bf16.mxu0 %v1691_v13  ;;  %1721 = vmatprep.subr.bf16.mxu1 %v1872_v47  ;;  %v1731_v13 = vpack.c.bf16 %v2628_v0, %v2427_v45 }
 0x393   : > { %1185 = vperm.xlu0 %1784, %v1254_v8  }
 0x395   : > { %1694 = vmatpush1.bf16.msra.mxu0 %v1693_v4  ;;  %1723 = vmatpush3.bf16.msra.mxu1 %v1722_v7  ;;  %v1734_v4 = vpack.c.bf16 %v2445_v50, %v2439_v54  ;;  %v2632_v7 = vld [vmem:[#allocation18_spill] sm:$0xff] }
 0x396   : > { %1696 = vmatprep.subr.bf16.mxu0 %v1695_v5  ;;  %1724 = vmatprep.subr.bf16.mxu1 %v1872_v47  ;;  %v2631_v5 = vld [vmem:[#allocation16_spill] sm:$0xff] }
 0x397   : > { %v1737_v8 = vpack.c.bf16 %v2632_v7, %v2631_v5  ;;  %v1160_v7 = vld [vmem:[%s1157_s20 + $0x10] sm:$0xff] }
 0x399   : > { %1698 = vmatpush1.bf16.msra.mxu0 %v1697_v11  ;;  %1726 = vmatpush3.bf16.msra.mxu1 %v1725_v48  ;;  %v1011_v11 = vld [vmem:[#allocation4] sm:$0xff]  ;;  %v1159_v48 = vld [vmem:[%s1157_s20 + $0x8] sm:$0xff] }
 0x39a   : > { %1700 = vmatprep.subr.bf16.mxu0 %v1699_v51  ;;  %1727 = vmatprep.subr.bf16.mxu1 %v1872_v47  ;;  %v1158_v51 = vld [vmem:[%s1157_s20] sm:$0xff] }
 0x39d   : > { %1702 = vmatpush1.bf16.msra.mxu0 %v1701_v60  ;;  %1729 = vmatpush3.bf16.msra.mxu1 %v1728_v10 }
 0x39e   : > { %1704 = vmatprep.subr.bf16.mxu0 %v1703_v61  ;;  %1730 = vmatprep.subr.bf16.mxu1 %v1872_v47 }
 0x3a1   : > { %1706 = vmatpush1.bf16.msra.mxu0 %v1705_v9  ;;  %1732 = vmatpush3.bf16.msra.mxu1 %v1731_v13 }
 0x3a2   : > { %1708 = vmatprep.subr.bf16.mxu0 %v1707_v12  ;;  %1733 = vmatprep.subr.bf16.mxu1 %v1872_v47 }
 0x3a5   : > { %1710 = vmatpush1.bf16.msra.mxu0 %v1709_v58  ;;  %1735 = vmatpush3.bf16.msra.mxu1 %v1734_v4 }
 0x3a6   : > { %1712 = vmatprep.subr.bf16.mxu0 %v1711_v63  ;;  %1736 = vmatprep.subr.bf16.mxu1 %v1872_v47 }
 0x3a9   : > { %1714 = vmatpush1.bf16.msra.mxu0 %v1713_v6  ;;  %1738 = vmatpush3.bf16.msra.mxu1 %v1737_v8 }
 0x3ac   : > { %1077 = vmatmul.mubr.f32.vlgmr.msra.gmra.mrb[0].mxu0 %v1011_v11  ;;  %1497 = vmatmul.mubr.f32.vlgmr.msra.gmra.mrb[0].mxu1 %v1011_v11 }
 0x47f   : > { %v1078_v60 = vpop.f32.mrb[0].mxu0  ;;  %v1149_v9 = vpop.f32.mrb[0].mxu1 }
 0x480   : > { %v1161_v61 = vadd.f32 %v1158_v51, %v1078_v60  ;;  %v1080_v10 = vpop.f32.mrb[1].mxu0  ;;  %v1498_v13 = vpop.f32.mrb[1].mxu1  ;;  %v1171_v6 = vadd.f32 %v2633_v57, %v1149_v9 }
 0x481   : > { %v1162_v12 = vadd.f32 %v1159_v48, %v1080_v10  ;;  %v1186_v13 = vpop.permute.xlu0 %1185 }
 0x482   : > { %v1163_v58 = vmul.f32 0.5, %v1161_v61 }
 0x483   : > { %v1164_v47 = vmul.f32 0.5, %v1162_v12 }
 0x484   : > { %1785 = vtanh.f32 %v1163_v58 }
 0x485   : > { %1787 = vtanh.f32 %v1164_v47 }
 0x48e   : > { %v1786_v63 = vpop.eup %1785 }
 0x48f   : > { %v1167_v4 = vmul.f32 0.5, %v1786_v63  ;;  %v1788_v0 = vpop.eup %1787 }
 0x490   : > { %v1168_v51 = vmul.f32 0.5, %v1788_v0 }
 0x491   : > { %v1169_v5 = vadd.f32 0.5, %v1167_v4 }
 0x492   : > { %v1170_v60 = vadd.f32 0.5, %v1168_v51 }
 0x493   : > { %v1172_v8 = vmul.f32 %v1171_v6, %v1169_v5 }
 0x494   : > { %v1175_v2 = vsub.f32 1.0, %v1170_v60  ;;  %v1177_v61 = vmul.f32 %v1170_v60, %v1011_v11 }
 0x495   : > { %v1173_v1 = vadd.f32 %v1172_v8, %v1160_v7 }
 0x497   : > { %1789 = vtanh.f32 %v1173_v1 }
 0x4a1   : > { %v1790_v48 = vpop.eup %1789 }
 0x4a2   : > { %v1176_v10 = vmul.f32 %v1790_v48, %v1175_v2 }
 0x4a4   : > { %v1178_v12 = vadd.f32 %v1177_v61, %v1176_v10 }
 0x4a6   : > { %v1188_v9 = vmul.f32 %v1186_v13, %v1178_v12  ;;  %v1189_v58 = vsub.f32 %v1178_v12, %v1011_v11  ;;  %1009 = sbr.rel (!%p1006_p4) target bundleno = 906 (0x38a), region = 110 }
 0x4a8   : > { %v1190_v47 = vmul.f32 %v1189_v58, %v1186_v13  ;;  %1194 = vst [vmem:[%s1193_s1] sm:$0xff] %v1188_v9 }
 0x4aa   : > { %v1191_v63 = vadd.f32 %v1190_v47, %v1011_v11 }
 0x4ac   : > { %1192 = vst [vmem:[#allocation4] sm:$0xff] %v1191_v63 }
 0x4ad PF:  { %p1238_p5 = scmp.ge.s32.totalorder %s2579_s0, 8 }
 0x4ae   :  { %s1859_s29 = smov (!%p1238_p5), %s2579_s0  }
 0x4af   :  { %1239 = sbr.rel (%p1238_p5) target bundleno = 1216 (0x4c0), region = 115 }
 0x4b3   :  { %v1195_v1 = vld [vmem:[#allocation4] sm:$0xff] }
 0x4b4   :  { %1255 = vst [vmem:[%s2589_s10 + $0x8] sm:$0xff] %v1195_v1 }
 0x4b6 LB: > { %s1256_s4 = sshll.u32 %s1861_s29, 3  ;;  %v1876_v14 = vmov 0.0   ;;  %s1201_s29 = sadd.s32 1, %s1861_s29   ;;  %s1861_s29 = sphi %s1859_s29, %s1201_s29  }
 0x4b7   : > { %s1205_s12 = scalar_lea.vmem %s2588_s9, %s1256_s4  ;;  %p1200_p6 = scmp.ge.s32.totalorder %s1201_s29, 8 }
 0x4b8   : > { %1206 = vst [vmem:[%s1205_s12] sm:$0xff] %v1876_v14 }
 0x4b9   :  { %1203 = sbr.rel (!%p1200_p6) target bundleno = 1206 (0x4b6), region = 121 }
 0x4c0 PF:  { %1215 = vsyncpa [#allocation8], 1 }
 0x4c1   :  { %1216 = vsyncpa [#allocation10], 1 }

</bundles_post_ra>
